<compile_context>
chip_gen: v7x
topology: tpu7x:2x2x1
jax: 0.10.0
libtpu: 0.0.40
codegen_flags: <defaults>
</compile_context>

<pallas_src>
import functools

import jax
import jax.numpy as jnp
from jax import lax
from jax.experimental import pallas as pl
from jax.experimental.pallas import tpu as pltpu

# ----------------------------- small ViT config ------------------------------
PATCH = 16
IN_CHANS = 3
IMG_H, IMG_W = 32, 48          # small stand-in for config height=256, width=576
EMBED_DIM = 128                # stand-in for 768 (multiple of 128 -> lane-dense)
DEPTH = 2                      # stand-in for 12
NUM_HEADS = 2                  # stand-in for 12 (head_dim = 64, same as real model)
MLP_RATIO = 4
HIDDEN_DIM = MLP_RATIO * EMBED_DIM
LN_EPS = 1e-6                  # timm ViT: partial(nn.LayerNorm, eps=1e-6)

N_PATCHES = (IMG_H // PATCH) * (IMG_W // PATCH)   # 2 * 3 = 6
N_SEQ = N_PATCHES + 2                             # + cls + dist = 8
K_PATCH = IN_CHANS * PATCH * PATCH                # 768

_BLOCK_PARAM_NAMES = (
    "ln1_g", "ln1_b", "qkv_w", "qkv_b", "proj_w", "proj_b",
    "ln2_g", "ln2_b", "fc1_w", "fc1_b", "fc2_w", "fc2_b",
)


# --------------------------------- helpers -----------------------------------
def _layernorm(x, g, b, eps=LN_EPS):
    mu = jnp.mean(x, axis=-1, keepdims=True)
    var = jnp.mean((x - mu) ** 2, axis=-1, keepdims=True)
    return (x - mu) * lax.rsqrt(var + eps) * g + b


def _gelu(x):
    # TODO(synk): torch nn.GELU defaults to the exact erf GELU; tanh
    # approximation is used here for guaranteed Mosaic lowering.
    return jax.nn.gelu(x, approximate=True)


# --------------------------------- kernel ------------------------------------
def backbone_kernel(
        patches_ref, pw_ref, pb_ref, cls_ref, dist_ref, pos_ref,
        ln1g_ref, ln1b_ref, qkvw_ref, qkvb_ref, projw_ref, projb_ref,
        ln2g_ref, ln2b_ref, fc1w_ref, fc1b_ref, fc2w_ref, fc2b_ref,
        normg_ref, normb_ref,
        out_ref,
        x_sc,
        *, batch, n_seq, dim, num_heads):
    depth_idx = pl.program_id(0)
    n_patches = n_seq - 2
    head_dim = dim // num_heads

    # ---- step 0: fused patch-embed + [cls]/[dist] prepend + pos_embed --------
    @pl.when(depth_idx == 0)
    def _init():
        emb = jnp.dot(patches_ref[...].astype(jnp.bfloat16), pw_ref[...],
                      preferred_element_type=jnp.float32) + pb_ref[...]
        emb = emb.reshape(batch, n_patches, dim)
        cls = jnp.broadcast_to(cls_ref[...], (batch, 1, dim))
        dst = jnp.broadcast_to(dist_ref[...], (batch, 1, dim))
        seq = jnp.concatenate([cls, dst, emb], axis=1) + pos_ref[...]
        x_sc[...] = seq.reshape(batch * n_seq, dim)
        # pos_drop is identity in eval mode.

    # ---- transformer block `depth_idx` (activation resident in VMEM) ---------
    x = x_sc[...]                                          # (B*N, D) f32

    # multi-head self-attention (pre-LN); 1/sqrt(head_dim) is already folded
    # into the q-columns of qkv_w / qkv_b (see pack_params).
    h = _layernorm(x, ln1g_ref[0], ln1b_ref[0])
    qkv = jnp.dot(h.astype(jnp.bfloat16), qkvw_ref[0],
                  preferred_element_type=jnp.float32) + qkvb_ref[0]
    q = qkv[:, :dim].reshape(batch, n_seq, dim)
    k = qkv[:, dim:2 * dim].reshape(batch, n_seq, dim)
    v = qkv[:, 2 * dim:].reshape(batch, n_seq, dim)

    head_outs = []
    for h_i in range(num_heads):                           # static, tiny H
        sl = slice(h_i * head_dim, (h_i + 1) * head_dim)
        qh = q[:, :, sl].astype(jnp.bfloat16)
        kh = k[:, :, sl].astype(jnp.bfloat16)
        vh = v[:, :, sl].astype(jnp.bfloat16)
        # batched over B, contracting on head_dim -- no explicit transpose.
        s = jnp.einsum('bqd,bkd->bqk', qh, kh,
                       preferred_element_type=jnp.float32)
        s = s - jnp.max(s, axis=-1, keepdims=True)
        p = jnp.exp(s)
        p = p * pl.reciprocal(jnp.sum(p, axis=-1, keepdims=True), approx=True)
        head_outs.append(
            jnp.einsum('bqk,bkd->bqd', p.astype(jnp.bfloat16), vh,
                       preferred_element_type=jnp.float32))
    attn = jnp.concatenate(head_outs, axis=-1).reshape(batch * n_seq, dim)
    attn = jnp.dot(attn.astype(jnp.bfloat16), projw_ref[0],
                   preferred_element_type=jnp.float32) + projb_ref[0]
    x = x + attn

    # MLP (pre-LN)
    h2 = _layernorm(x, ln2g_ref[0], ln2b_ref[0])
    m = jnp.dot(h2.astype(jnp.bfloat16), fc1w_ref[0],
                preferred_element_type=jnp.float32) + fc1b_ref[0]
    m = _gelu(m)
    m = jnp.dot(m.astype(jnp.bfloat16), fc2w_ref[0],
                preferred_element_type=jnp.float32) + fc2b_ref[0]
    x = x + m
    x_sc[...] = x

    # ---- last step: final LayerNorm, single lane-dense HBM writeback ---------
    @pl.when(depth_idx == pl.num_programs(0) - 1)
    def _final():
        out_ref[...] = _layernorm(x, normg_ref[...], normb_ref[...]
                                  ).reshape(batch, n_seq, dim)


# ------------------------------ full forward ---------------------------------
def backbone_forward(x, packed):
    """Equivalent of Backbone.forward -> net.forward_features(x).

    x: (B, C, H, W) float32 (NCHW like PyTorch).
    Returns (cls_features, dist_features), each (B, EMBED_DIM).
    """
    bsz, c, hh, ww = x.shape
    gh, gw = hh // PATCH, ww // PATCH
    n_patches = gh * gw
    n_seq = n_patches + 2
    d = EMBED_DIM

    # Conv2d(kernel=stride=PATCH) == per-patch matmul; patch extraction in
    # (c, ph, pw) order matches the conv-weight flattening used in pack_params.
    patches = x.reshape(bsz, c, gh, PATCH, gw, PATCH)
    patches = jnp.transpose(patches, (0, 2, 4, 1, 3, 5))
    flat = patches.reshape(bsz * n_patches, c * PATCH * PATCH)

    def const_spec(shape):                   # params identical across depth steps
        nd = len(shape)
        return pl.BlockSpec(shape, lambda dd, _nd=nd: (0,) * _nd)

    def per_depth_spec(shape):               # stacked (DEPTH, ...) params
        nd = len(shape)
        return pl.BlockSpec((1,) + shape[1:],
                            lambda dd, _nd=nd: (dd,) + (0,) * (_nd - 1))

    in_specs = [
        const_spec(flat.shape),
        const_spec(packed["patch_w"].shape),
        const_spec(packed["patch_b"].shape),
        const_spec(packed["cls_token"].shape),
        const_spec(packed["dist_token"].shape),
        const_spec(packed["pos_embed"].shape),
    ]
    in_specs += [per_depth_spec(packed[n].shape) for n in _BLOCK_PARAM_NAMES]
    in_specs += [const_spec(packed["norm_g"].shape),
                 const_spec(packed["norm_b"].shape)]

    out = pl.pallas_call(
        functools.partial(backbone_kernel, batch=bsz, n_seq=n_seq,
                          dim=d, num_heads=NUM_HEADS),
        out_shape=jax.ShapeDtypeStruct((bsz, n_seq, d), jnp.float32),
        grid=(DEPTH,),
        in_specs=in_specs,
        out_specs=pl.BlockSpec((bsz, n_seq, d), lambda dd: (0, 0, 0)),
        scratch_shapes=[pltpu.VMEM((bsz * n_seq, d), jnp.float32)],
        compiler_params=pltpu.CompilerParams(
            dimension_semantics=("arbitrary",)),   # activation carried across depth
    )(flat, packed["patch_w"], packed["patch_b"], packed["cls_token"],
      packed["dist_token"], packed["pos_embed"],
      *[packed[n] for n in _BLOCK_PARAM_NAMES],
      packed["norm_g"], packed["norm_b"])

    return out[:, 0], out[:, 1]


# ---------------------------- deterministic init ------------------------------
def init_params(key):
    d = EMBED_DIM
    hid = HIDDEN_DIM
    keys = iter(jax.random.split(key, 64))

    def nrm(shape, scale=0.02):
        return scale * jax.random.normal(next(keys), shape, dtype=jnp.float32)

    params = {
        "patch_w": nrm((K_PATCH, d)),
        "patch_b": jnp.zeros((1, d), jnp.float32),
        "cls_token": nrm((1, 1, d)),
        "dist_token": nrm((1, 1, d)),
        "pos_embed": nrm((1, N_SEQ, d)),
        "norm_g": jnp.ones((1, d), jnp.float32),
        "norm_b": jnp.zeros((1, d), jnp.float32),
        "blocks": [],
    }
    for _ in range(DEPTH):
        params["blocks"].append({
            "ln1_g": jnp.ones((1, d), jnp.float32),
            "ln1_b": jnp.zeros((1, d), jnp.float32),
            "qkv_w": nrm((d, 3 * d)),
            "qkv_b": jnp.zeros((1, 3 * d), jnp.float32),
            "proj_w": nrm((d, d)),
            "proj_b": jnp.zeros((1, d), jnp.float32),
            "ln2_g": jnp.ones((1, d), jnp.float32),
            "ln2_b": jnp.zeros((1, d), jnp.float32),
            "fc1_w": nrm((d, hid)),
            "fc1_b": jnp.zeros((1, hid), jnp.float32),
            "fc2_w": nrm((hid, d)),
            "fc2_b": jnp.zeros((1, d), jnp.float32),
        })
    return params


def pack_params(params):
    """Stack per-block params along a depth axis, fold the 1/sqrt(head_dim)
    attention scale into the q-columns of qkv (mathematically equivalent),
    and cast matmul weight matrices to bf16 (MXU operands); LN params, biases
    and token/pos embeddings stay f32."""
    d = EMBED_DIM
    scale = (d // NUM_HEADS) ** -0.5
    packed = {
        "patch_w": params["patch_w"].astype(jnp.bfloat16),
        "patch_b": params["patch_b"],
        "cls_token": params["cls_token"],
        "dist_token": params["dist_token"],
        "pos_embed": params["pos_embed"],
        "norm_g": params["norm_g"],
        "norm_b": params["norm_b"],
    }
    stacked = {n: jnp.stack([blk[n] for blk in params["blocks"]], axis=0)
               for n in _BLOCK_PARAM_NAMES}
    stacked["qkv_w"] = jnp.concatenate(
        [stacked["qkv_w"][:, :, :d] * scale, stacked["qkv_w"][:, :, d:]], axis=-1)
    stacked["qkv_b"] = jnp.concatenate(
        [stacked["qkv_b"][:, :, :d] * scale, stacked["qkv_b"][:, :, d:]], axis=-1)
    for n in ("qkv_w", "proj_w", "fc1_w", "fc2_w"):
        stacked[n] = stacked[n].astype(jnp.bfloat16)
    packed.update(stacked)
    return packed


if __name__ == "__main__":
    root = jax.random.PRNGKey(0)
    k_param, k_x = jax.random.split(root)
    params = init_params(k_param)
    packed = pack_params(params)
    x = jax.random.normal(k_x, (2, IN_CHANS, IMG_H, IMG_W), dtype=jnp.float32)

    fwd = jax.jit(backbone_forward)
    cls_feat, dist_feat = fwd(x, packed)
    jax.block_until_ready((cls_feat, dist_feat))

    assert cls_feat.shape == (2, EMBED_DIM)
    assert dist_feat.shape == (2, EMBED_DIM)
    assert jnp.all(jnp.isfinite(cls_feat)) and jnp.all(jnp.isfinite(dist_feat))
    print("KERNEL_OK")
</pallas_src>

<mosaic_0001>
module attributes {stable_mosaic.version = 11 : i64} {
  func.func @backbone_kernel(%arg0: i32, %arg1: memref<12x768xf32, #tpu.memory_space<vmem>>, %arg2: memref<768x128xbf16, #tpu.memory_space<vmem>>, %arg3: memref<1x128xf32, #tpu.memory_space<vmem>>, %arg4: memref<1x1x128xf32, #tpu.memory_space<vmem>>, %arg5: memref<1x1x128xf32, #tpu.memory_space<vmem>>, %arg6: memref<1x8x128xf32, #tpu.memory_space<vmem>>, %arg7: memref<1x1x128xf32, #tpu.memory_space<vmem>>, %arg8: memref<1x1x128xf32, #tpu.memory_space<vmem>>, %arg9: memref<1x128x384xbf16, #tpu.memory_space<vmem>>, %arg10: memref<1x1x384xf32, #tpu.memory_space<vmem>>, %arg11: memref<1x128x128xbf16, #tpu.memory_space<vmem>>, %arg12: memref<1x1x128xf32, #tpu.memory_space<vmem>>, %arg13: memref<1x1x128xf32, #tpu.memory_space<vmem>>, %arg14: memref<1x1x128xf32, #tpu.memory_space<vmem>>, %arg15: memref<1x128x512xbf16, #tpu.memory_space<vmem>>, %arg16: memref<1x1x512xf32, #tpu.memory_space<vmem>>, %arg17: memref<1x512x128xbf16, #tpu.memory_space<vmem>>, %arg18: memref<1x1x128xf32, #tpu.memory_space<vmem>>, %arg19: memref<1x128xf32, #tpu.memory_space<vmem>>, %arg20: memref<1x128xf32, #tpu.memory_space<vmem>>, %arg21: memref<2x8x128xf32, #tpu.memory_space<vmem>>, %arg22: memref<16x128xf32, #tpu.memory_space<vmem>>) attributes {dimension_semantics = [#tpu.dimension_semantics<arbitrary>], iteration_bounds = array<i64: 2>, scalar_prefetch = 0 : i64, scratch_operands = 1 : i64, tpu.core_type = #tpu.core_type<tc>, window_params = [{pipeline_mode = #tpu.pipeline_mode<synchronous>, transform_indices = @transform_0, window_bounds = array<i64: 12, 768>}, {pipeline_mode = #tpu.pipeline_mode<synchronous>, transform_indices = @transform_1, window_bounds = array<i64: 768, 128>}, {pipeline_mode = #tpu.pipeline_mode<synchronous>, transform_indices = @transform_2, window_bounds = array<i64: 1, 128>}, {pipeline_mode = #tpu.pipeline_mode<synchronous>, transform_indices = @transform_3, window_bounds = array<i64: 1, 1, 128>}, {pipeline_mode = #tpu.pipeline_mode<synchronous>, transform_indices = @transform_4, window_bounds = array<i64: 1, 1, 128>}, {pipeline_mode = #tpu.pipeline_mode<synchronous>, transform_indices = @transform_5, window_bounds = array<i64: 1, 8, 128>}, {transform_indices = @transform_6, window_bounds = array<i64: 1, 1, 128>}, {transform_indices = @transform_7, window_bounds = array<i64: 1, 1, 128>}, {transform_indices = @transform_8, window_bounds = array<i64: 1, 128, 384>}, {transform_indices = @transform_9, window_bounds = array<i64: 1, 1, 384>}, {transform_indices = @transform_10, window_bounds = array<i64: 1, 128, 128>}, {transform_indices = @transform_11, window_bounds = array<i64: 1, 1, 128>}, {transform_indices = @transform_12, window_bounds = array<i64: 1, 1, 128>}, {transform_indices = @transform_13, window_bounds = array<i64: 1, 1, 128>}, {transform_indices = @transform_14, window_bounds = array<i64: 1, 128, 512>}, {transform_indices = @transform_15, window_bounds = array<i64: 1, 1, 512>}, {transform_indices = @transform_16, window_bounds = array<i64: 1, 512, 128>}, {transform_indices = @transform_17, window_bounds = array<i64: 1, 1, 128>}, {pipeline_mode = #tpu.pipeline_mode<synchronous>, transform_indices = @transform_18, window_bounds = array<i64: 1, 128>}, {pipeline_mode = #tpu.pipeline_mode<synchronous>, transform_indices = @transform_19, window_bounds = array<i64: 1, 128>}, {pipeline_mode = #tpu.pipeline_mode<synchronous>, transform_indices = @transform_20, window_bounds = array<i64: 2, 8, 128>}]} {
    %c0_i32 = arith.constant 0 : i32
    %0 = arith.cmpi eq, %arg0, %c0_i32 : i32
    %1 = arith.extui %0 : i1 to i32
    %c0_i32_0 = arith.constant 0 : i32
    %2 = arith.cmpi ne, %1, %c0_i32_0 : i32
    scf.if %2 {
      %c0_66 = arith.constant 0 : index
      %c0_67 = arith.constant 0 : index
      %153 = vector.load %arg1[%c0_66, %c0_67] : memref<12x768xf32, #tpu.memory_space<vmem>>, vector<12x768xf32>
      %154 = arith.truncf %153 : vector<12x768xf32> to vector<12x768xbf16>
      %c0_68 = arith.constant 0 : index
      %c0_69 = arith.constant 0 : index
      %155 = vector.load %arg2[%c0_68, %c0_69] : memref<768x128xbf16, #tpu.memory_space<vmem>>, vector<768x128xbf16>
      %cst_70 = arith.constant dense<0.000000e+00> : vector<12x128xf32>
      %156 = tpu.matmul %154, %155, %cst_70 {dimension_numbers = #tpu.dot_dimension_numbers<[1], [0], [0], [1], [0, 0, 1, 1], [], []>} : vector<12x768xbf16>, vector<768x128xbf16>, vector<12x128xf32> -> vector<12x128xf32>
      %c0_71 = arith.constant 0 : index
      %c0_72 = arith.constant 0 : index
      %157 = vector.load %arg3[%c0_71, %c0_72] : memref<1x128xf32, #tpu.memory_space<vmem>>, vector<1x128xf32>
      %158 = vector.broadcast %157 : vector<1x128xf32> to vector<12x128xf32>
      %159 = arith.addf %156, %158 : vector<12x128xf32>
      %160 = vector.shape_cast %159 : vector<12x128xf32> to vector<2x6x128xf32>
      %c0_73 = arith.constant 0 : index
      %c0_74 = arith.constant 0 : index
      %c0_75 = arith.constant 0 : index
      %161 = vector.load %arg4[%c0_73, %c0_74, %c0_75] : memref<1x1x128xf32, #tpu.memory_space<vmem>>, vector<1x1x128xf32>
      %162 = vector.shape_cast %161 : vector<1x1x128xf32> to vector<1x1x128xf32>
      %163 = vector.broadcast %162 : vector<1x1x128xf32> to vector<2x1x128xf32>
      %c0_76 = arith.constant 0 : index
      %c0_77 = arith.constant 0 : index
      %c0_78 = arith.constant 0 : index
      %164 = vector.load %arg5[%c0_76, %c0_77, %c0_78] : memref<1x1x128xf32, #tpu.memory_space<vmem>>, vector<1x1x128xf32>
      %165 = vector.shape_cast %164 : vector<1x1x128xf32> to vector<1x1x128xf32>
      %166 = vector.broadcast %165 : vector<1x1x128xf32> to vector<2x1x128xf32>
      %167 = tpu.concatenate %163, %166, %160 in 1 : vector<2x1x128xf32>, vector<2x1x128xf32>, vector<2x6x128xf32> -> vector<2x8x128xf32>
      %c0_79 = arith.constant 0 : index
      %c0_80 = arith.constant 0 : index
      %c0_81 = arith.constant 0 : index
      %168 = vector.load %arg6[%c0_79, %c0_80, %c0_81] : memref<1x8x128xf32, #tpu.memory_space<vmem>>, vector<1x8x128xf32>
      %169 = vector.broadcast %168 : vector<1x8x128xf32> to vector<2x8x128xf32>
      %170 = arith.addf %167, %169 : vector<2x8x128xf32>
      %171 = vector.shape_cast %170 : vector<2x8x128xf32> to vector<16x128xf32>
      %c0_82 = arith.constant 0 : index
      %c0_83 = arith.constant 0 : index
      %172 = vector.load %arg22[%c0_82, %c0_83] : memref<16x128xf32, #tpu.memory_space<vmem>>, vector<16x128xf32>
      tpu.vector_store %arg22[%c0_82, %c0_83], %171 {strides = array<i32>} : memref<16x128xf32, #tpu.memory_space<vmem>>, vector<16x128xf32>,
    } else {
    }
    %c0 = arith.constant 0 : index
    %c0_1 = arith.constant 0 : index
    %3 = vector.load %arg22[%c0, %c0_1] : memref<16x128xf32, #tpu.memory_space<vmem>>, vector<16x128xf32>
    %c0_2 = arith.constant 0 : index
    %c0_3 = arith.constant 0 : index
    %c0_4 = arith.constant 0 : index
    %4 = vector.load %arg7[%c0_2, %c0_3, %c0_4] : memref<1x1x128xf32, #tpu.memory_space<vmem>>, vector<1x1x128xf32>
    %5 = vector.shape_cast %4 : vector<1x1x128xf32> to vector<1x128xf32>
    %c0_5 = arith.constant 0 : index
    %c0_6 = arith.constant 0 : index
    %c0_7 = arith.constant 0 : index
    %6 = vector.load %arg8[%c0_5, %c0_6, %c0_7] : memref<1x1x128xf32, #tpu.memory_space<vmem>>, vector<1x1x128xf32>
    %7 = vector.shape_cast %6 : vector<1x1x128xf32> to vector<1x128xf32>
    %cst = arith.constant dense<0.000000e+00> : vector<16xf32>
    %8 = vector.multi_reduction <add>, %3, %cst [1] : vector<16x128xf32> to vector<16xf32>
    %9 = vector.shape_cast %8 : vector<16xf32> to vector<16x1xf32>
    %cst_8 = arith.constant 1.280000e+02 : f32
    %10 = vector.broadcast %cst_8 : f32 to vector<16x1xf32>
    %11 = arith.divf %9, %10 : vector<16x1xf32>
    %12 = vector.broadcast %11 : vector<16x1xf32> to vector<16x128xf32>
    %13 = arith.subf %3, %12 : vector<16x128xf32>
    %14 = arith.mulf %13, %13 : vector<16x128xf32>
    %cst_9 = arith.constant dense<0.000000e+00> : vector<16xf32>
    %15 = vector.multi_reduction <add>, %14, %cst_9 [1] : vector<16x128xf32> to vector<16xf32>
    %16 = vector.shape_cast %15 : vector<16xf32> to vector<16x1xf32>
    %cst_10 = arith.constant 1.280000e+02 : f32
    %17 = vector.broadcast %cst_10 : f32 to vector<16x1xf32>
    %18 = arith.divf %16, %17 : vector<16x1xf32>
    %19 = vector.broadcast %11 : vector<16x1xf32> to vector<16x128xf32>
    %20 = arith.subf %3, %19 : vector<16x128xf32>
    %cst_11 = arith.constant 9.99999997E-7 : f32
    %21 = vector.broadcast %cst_11 : f32 to vector<16x1xf32>
    %22 = arith.addf %18, %21 : vector<16x1xf32>
    %23 = math.rsqrt %22 : vector<16x1xf32>
    %24 = vector.broadcast %23 : vector<16x1xf32> to vector<16x128xf32>
    %25 = arith.mulf %20, %24 : vector<16x128xf32>
    %26 = vector.broadcast %5 : vector<1x128xf32> to vector<16x128xf32>
    %27 = arith.mulf %25, %26 : vector<16x128xf32>
    %28 = vector.broadcast %7 : vector<1x128xf32> to vector<16x128xf32>
    %29 = arith.addf %27, %28 : vector<16x128xf32>
    %30 = arith.truncf %29 : vector<16x128xf32> to vector<16x128xbf16>
    %c0_12 = arith.constant 0 : index
    %c0_13 = arith.constant 0 : index
    %c0_14 = arith.constant 0 : index
    %31 = vector.load %arg9[%c0_12, %c0_13, %c0_14] : memref<1x128x384xbf16, #tpu.memory_space<vmem>>, vector<1x128x384xbf16>
    %32 = vector.shape_cast %31 : vector<1x128x384xbf16> to vector<128x384xbf16>
    %cst_15 = arith.constant dense<0.000000e+00> : vector<16x384xf32>
    %33 = tpu.matmul %30, %32, %cst_15 {dimension_numbers = #tpu.dot_dimension_numbers<[1], [0], [0], [1], [0, 0, 1, 1], [], []>} : vector<16x128xbf16>, vector<128x384xbf16>, vector<16x384xf32> -> vector<16x384xf32>
    %c0_16 = arith.constant 0 : index
    %c0_17 = arith.constant 0 : index
    %c0_18 = arith.constant 0 : index
    %34 = vector.load %arg10[%c0_16, %c0_17, %c0_18] : memref<1x1x384xf32, #tpu.memory_space<vmem>>, vector<1x1x384xf32>
    %35 = vector.shape_cast %34 : vector<1x1x384xf32> to vector<1x384xf32>
    %36 = vector.broadcast %35 : vector<1x384xf32> to vector<16x384xf32>
    %37 = arith.addf %33, %36 : vector<16x384xf32>
    %38 = vector.extract_strided_slice %37 {offsets = [0, 0], sizes = [16, 128], strides = [1, 1]} : vector<16x384xf32> to vector<16x128xf32>
    %39 = vector.shape_cast %38 : vector<16x128xf32> to vector<2x8x128xf32>
    %40 = vector.extract_strided_slice %37 {offsets = [0, 128], sizes = [16, 128], strides = [1, 1]} : vector<16x384xf32> to vector<16x128xf32>
    %41 = vector.shape_cast %40 : vector<16x128xf32> to vector<2x8x128xf32>
    %42 = vector.extract_strided_slice %37 {offsets = [0, 256], sizes = [16, 128], strides = [1, 1]} : vector<16x384xf32> to vector<16x128xf32>
    %43 = vector.shape_cast %42 : vector<16x128xf32> to vector<2x8x128xf32>
    %44 = vector.extract_strided_slice %39 {offsets = [0, 0, 0], sizes = [2, 8, 64], strides = [1, 1, 1]} : vector<2x8x128xf32> to vector<2x8x64xf32>
    %45 = arith.truncf %44 : vector<2x8x64xf32> to vector<2x8x64xbf16>
    %46 = vector.extract_strided_slice %41 {offsets = [0, 0, 0], sizes = [2, 8, 64], strides = [1, 1, 1]} : vector<2x8x128xf32> to vector<2x8x64xf32>
    %47 = arith.truncf %46 : vector<2x8x64xf32> to vector<2x8x64xbf16>
    %48 = vector.extract_strided_slice %43 {offsets = [0, 0, 0], sizes = [2, 8, 64], strides = [1, 1, 1]} : vector<2x8x128xf32> to vector<2x8x64xf32>
    %49 = arith.truncf %48 : vector<2x8x64xf32> to vector<2x8x64xbf16>
    "tpu.trace_start"() <{level = 10 : i32, message = "bqd,bkd->bqk"}> : () -> ()
    %cst_19 = arith.constant dense<0.000000e+00> : vector<2x8x8xf32>
    %50 = tpu.matmul %45, %47, %cst_19 {dimension_numbers = #tpu.dot_dimension_numbers<[2], [2], [1], [1], [0, 0, 0, 1, 1, 1], [0], [0]>} : vector<2x8x64xbf16>, vector<2x8x64xbf16>, vector<2x8x8xf32> -> vector<2x8x8xf32>
    "tpu.trace_stop"() : () -> ()
    %cst_20 = arith.constant dense<0xFF800000> : vector<2x8xf32>
    %51 = vector.multi_reduction <maximumf>, %50, %cst_20 [2] : vector<2x8x8xf32> to vector<2x8xf32>
    %52 = vector.shape_cast %51 : vector<2x8xf32> to vector<2x8x1xf32>
    %53 = vector.broadcast %52 : vector<2x8x1xf32> to vector<2x8x8xf32>
    %54 = arith.subf %50, %53 : vector<2x8x8xf32>
    %55 = math.exp %54 : vector<2x8x8xf32>
    %cst_21 = arith.constant dense<0.000000e+00> : vector<2x8xf32>
    %56 = vector.multi_reduction <add>, %55, %cst_21 [2] : vector<2x8x8xf32> to vector<2x8xf32>
    %57 = vector.shape_cast %56 : vector<2x8xf32> to vector<2x8x1xf32>
    %58 = tpu.reciprocal %57 {approx = true} : vector<2x8x1xf32> -> vector<2x8x1xf32>
    %59 = vector.broadcast %58 : vector<2x8x1xf32> to vector<2x8x8xf32>
    %60 = arith.mulf %55, %59 : vector<2x8x8xf32>
    %61 = arith.truncf %60 : vector<2x8x8xf32> to vector<2x8x8xbf16>
    "tpu.trace_start"() <{level = 10 : i32, message = "bqk,bkd->bqd"}> : () -> ()
    %cst_22 = arith.constant dense<0.000000e+00> : vector<2x8x64xf32>
    %62 = tpu.matmul %61, %49, %cst_22 {dimension_numbers = #tpu.dot_dimension_numbers<[2], [1], [1], [2], [0, 0, 0, 1, 1, 2], [0], [0]>} : vector<2x8x8xbf16>, vector<2x8x64xbf16>, vector<2x8x64xf32> -> vector<2x8x64xf32>
    "tpu.trace_stop"() : () -> ()
    %63 = vector.extract_strided_slice %39 {offsets = [0, 0, 64], sizes = [2, 8, 64], strides = [1, 1, 1]} : vector<2x8x128xf32> to vector<2x8x64xf32>
    %64 = arith.truncf %63 : vector<2x8x64xf32> to vector<2x8x64xbf16>
    %65 = vector.extract_strided_slice %41 {offsets = [0, 0, 64], sizes = [2, 8, 64], strides = [1, 1, 1]} : vector<2x8x128xf32> to vector<2x8x64xf32>
    %66 = arith.truncf %65 : vector<2x8x64xf32> to vector<2x8x64xbf16>
    %67 = vector.extract_strided_slice %43 {offsets = [0, 0, 64], sizes = [2, 8, 64], strides = [1, 1, 1]} : vector<2x8x128xf32> to vector<2x8x64xf32>
    %68 = arith.truncf %67 : vector<2x8x64xf32> to vector<2x8x64xbf16>
    "tpu.trace_start"() <{level = 10 : i32, message = "bqd,bkd->bqk"}> : () -> ()
    %cst_23 = arith.constant dense<0.000000e+00> : vector<2x8x8xf32>
    %69 = tpu.matmul %64, %66, %cst_23 {dimension_numbers = #tpu.dot_dimension_numbers<[2], [2], [1], [1], [0, 0, 0, 1, 1, 1], [0], [0]>} : vector<2x8x64xbf16>, vector<2x8x64xbf16>, vector<2x8x8xf32> -> vector<2x8x8xf32>
    "tpu.trace_stop"() : () -> ()
    %cst_24 = arith.constant dense<0xFF800000> : vector<2x8xf32>
    %70 = vector.multi_reduction <maximumf>, %69, %cst_24 [2] : vector<2x8x8xf32> to vector<2x8xf32>
    %71 = vector.shape_cast %70 : vector<2x8xf32> to vector<2x8x1xf32>
    %72 = vector.broadcast %71 : vector<2x8x1xf32> to vector<2x8x8xf32>
    %73 = arith.subf %69, %72 : vector<2x8x8xf32>
    %74 = math.exp %73 : vector<2x8x8xf32>
    %cst_25 = arith.constant dense<0.000000e+00> : vector<2x8xf32>
    %75 = vector.multi_reduction <add>, %74, %cst_25 [2] : vector<2x8x8xf32> to vector<2x8xf32>
    %76 = vector.shape_cast %75 : vector<2x8xf32> to vector<2x8x1xf32>
    %77 = tpu.reciprocal %76 {approx = true} : vector<2x8x1xf32> -> vector<2x8x1xf32>
    %78 = vector.broadcast %77 : vector<2x8x1xf32> to vector<2x8x8xf32>
    %79 = arith.mulf %74, %78 : vector<2x8x8xf32>
    %80 = arith.truncf %79 : vector<2x8x8xf32> to vector<2x8x8xbf16>
    "tpu.trace_start"() <{level = 10 : i32, message = "bqk,bkd->bqd"}> : () -> ()
    %cst_26 = arith.constant dense<0.000000e+00> : vector<2x8x64xf32>
    %81 = tpu.matmul %80, %68, %cst_26 {dimension_numbers = #tpu.dot_dimension_numbers<[2], [1], [1], [2], [0, 0, 0, 1, 1, 2], [0], [0]>} : vector<2x8x8xbf16>, vector<2x8x64xbf16>, vector<2x8x64xf32> -> vector<2x8x64xf32>
    "tpu.trace_stop"() : () -> ()
    %82 = tpu.concatenate %62, %81 in 2 : vector<2x8x64xf32>, vector<2x8x64xf32> -> vector<2x8x128xf32>
    %83 = vector.shape_cast %82 : vector<2x8x128xf32> to vector<16x128xf32>
    %84 = arith.truncf %83 : vector<16x128xf32> to vector<16x128xbf16>
    %c0_27 = arith.constant 0 : index
    %c0_28 = arith.constant 0 : index
    %c0_29 = arith.constant 0 : index
    %85 = vector.load %arg11[%c0_27, %c0_28, %c0_29] : memref<1x128x128xbf16, #tpu.memory_space<vmem>>, vector<1x128x128xbf16>
    %86 = vector.shape_cast %85 : vector<1x128x128xbf16> to vector<128x128xbf16>
    %cst_30 = arith.constant dense<0.000000e+00> : vector<16x128xf32>
    %87 = tpu.matmul %84, %86, %cst_30 {dimension_numbers = #tpu.dot_dimension_numbers<[1], [0], [0], [1], [0, 0, 1, 1], [], []>} : vector<16x128xbf16>, vector<128x128xbf16>, vector<16x128xf32> -> vector<16x128xf32>
    %c0_31 = arith.constant 0 : index
    %c0_32 = arith.constant 0 : index
    %c0_33 = arith.constant 0 : index
    %88 = vector.load %arg12[%c0_31, %c0_32, %c0_33] : memref<1x1x128xf32, #tpu.memory_space<vmem>>, vector<1x1x128xf32>
    %89 = vector.shape_cast %88 : vector<1x1x128xf32> to vector<1x128xf32>
    %90 = vector.broadcast %89 : vector<1x128xf32> to vector<16x128xf32>
    %91 = arith.addf %87, %90 : vector<16x128xf32>
    %92 = arith.addf %3, %91 : vector<16x128xf32>
    %c0_34 = arith.constant 0 : index
    %c0_35 = arith.constant 0 : index
    %c0_36 = arith.constant 0 : index
    %93 = vector.load %arg13[%c0_34, %c0_35, %c0_36] : memref<1x1x128xf32, #tpu.memory_space<vmem>>, vector<1x1x128xf32>
    %94 = vector.shape_cast %93 : vector<1x1x128xf32> to vector<1x128xf32>
    %c0_37 = arith.constant 0 : index
    %c0_38 = arith.constant 0 : index
    %c0_39 = arith.constant 0 : index
    %95 = vector.load %arg14[%c0_37, %c0_38, %c0_39] : memref<1x1x128xf32, #tpu.memory_space<vmem>>, vector<1x1x128xf32>
    %96 = vector.shape_cast %95 : vector<1x1x128xf32> to vector<1x128xf32>
    %cst_40 = arith.constant dense<0.000000e+00> : vector<16xf32>
    %97 = vector.multi_reduction <add>, %92, %cst_40 [1] : vector<16x128xf32> to vector<16xf32>
    %98 = vector.shape_cast %97 : vector<16xf32> to vector<16x1xf32>
    %cst_41 = arith.constant 1.280000e+02 : f32
    %99 = vector.broadcast %cst_41 : f32 to vector<16x1xf32>
    %100 = arith.divf %98, %99 : vector<16x1xf32>
    %101 = vector.broadcast %100 : vector<16x1xf32> to vector<16x128xf32>
    %102 = arith.subf %92, %101 : vector<16x128xf32>
    %103 = arith.mulf %102, %102 : vector<16x128xf32>
    %cst_42 = arith.constant dense<0.000000e+00> : vector<16xf32>
    %104 = vector.multi_reduction <add>, %103, %cst_42 [1] : vector<16x128xf32> to vector<16xf32>
    %105 = vector.shape_cast %104 : vector<16xf32> to vector<16x1xf32>
    %cst_43 = arith.constant 1.280000e+02 : f32
    %106 = vector.broadcast %cst_43 : f32 to vector<16x1xf32>
    %107 = arith.divf %105, %106 : vector<16x1xf32>
    %108 = vector.broadcast %100 : vector<16x1xf32> to vector<16x128xf32>
    %109 = arith.subf %92, %108 : vector<16x128xf32>
    %cst_44 = arith.constant 9.99999997E-7 : f32
    %110 = vector.broadcast %cst_44 : f32 to vector<16x1xf32>
    %111 = arith.addf %107, %110 : vector<16x1xf32>
    %112 = math.rsqrt %111 : vector<16x1xf32>
    %113 = vector.broadcast %112 : vector<16x1xf32> to vector<16x128xf32>
    %114 = arith.mulf %109, %113 : vector<16x128xf32>
    %115 = vector.broadcast %94 : vector<1x128xf32> to vector<16x128xf32>
    %116 = arith.mulf %114, %115 : vector<16x128xf32>
    %117 = vector.broadcast %96 : vector<1x128xf32> to vector<16x128xf32>
    %118 = arith.addf %116, %117 : vector<16x128xf32>
    %119 = arith.truncf %118 : vector<16x128xf32> to vector<16x128xbf16>
    %c0_45 = arith.constant 0 : index
    %c0_46 = arith.constant 0 : index
    %c0_47 = arith.constant 0 : index
    %120 = vector.load %arg15[%c0_45, %c0_46, %c0_47] : memref<1x128x512xbf16, #tpu.memory_space<vmem>>, vector<1x128x512xbf16>
    %121 = vector.shape_cast %120 : vector<1x128x512xbf16> to vector<128x512xbf16>
    %cst_48 = arith.constant dense<0.000000e+00> : vector<16x512xf32>
    %122 = tpu.matmul %119, %121, %cst_48 {dimension_numbers = #tpu.dot_dimension_numbers<[1], [0], [0], [1], [0, 0, 1, 1], [], []>} : vector<16x128xbf16>, vector<128x512xbf16>, vector<16x512xf32> -> vector<16x512xf32>
    %c0_49 = arith.constant 0 : index
    %c0_50 = arith.constant 0 : index
    %c0_51 = arith.constant 0 : index
    %123 = vector.load %arg16[%c0_49, %c0_50, %c0_51] : memref<1x1x512xf32, #tpu.memory_space<vmem>>, vector<1x1x512xf32>
    %124 = vector.shape_cast %123 : vector<1x1x512xf32> to vector<1x512xf32>
    %125 = vector.broadcast %124 : vector<1x512xf32> to vector<16x512xf32>
    %126 = arith.addf %122, %125 : vector<16x512xf32>
    %127 = arith.mulf %126, %126 : vector<16x512xf32>
    %128 = arith.mulf %126, %127 : vector<16x512xf32>
    %cst_52 = arith.constant 4.471500e-02 : f32
    %129 = vector.broadcast %cst_52 : f32 to vector<16x512xf32>
    %130 = arith.mulf %129, %128 : vector<16x512xf32>
    %131 = arith.addf %126, %130 : vector<16x512xf32>
    %cst_53 = arith.constant 0.797884583 : f32
    %132 = vector.broadcast %cst_53 : f32 to vector<16x512xf32>
    %133 = arith.mulf %132, %131 : vector<16x512xf32>
    %134 = math.tanh %133 : vector<16x512xf32>
    %cst_54 = arith.constant 1.000000e+00 : f32
    %135 = vector.broadcast %cst_54 : f32 to vector<16x512xf32>
    %136 = arith.addf %135, %134 : vector<16x512xf32>
    %cst_55 = arith.constant 5.000000e-01 : f32
    %137 = vector.broadcast %cst_55 : f32 to vector<16x512xf32>
    %138 = arith.mulf %137, %136 : vector<16x512xf32>
    %139 = arith.mulf %126, %138 : vector<16x512xf32>
    %140 = arith.truncf %139 : vector<16x512xf32> to vector<16x512xbf16>
    %c0_56 = arith.constant 0 : index
    %c0_57 = arith.constant 0 : index
    %c0_58 = arith.constant 0 : index
    %141 = vector.load %arg17[%c0_56, %c0_57, %c0_58] : memref<1x512x128xbf16, #tpu.memory_space<vmem>>, vector<1x512x128xbf16>
    %142 = vector.shape_cast %141 : vector<1x512x128xbf16> to vector<512x128xbf16>
    %cst_59 = arith.constant dense<0.000000e+00> : vector<16x128xf32>
    %143 = tpu.matmul %140, %142, %cst_59 {dimension_numbers = #tpu.dot_dimension_numbers<[1], [0], [0], [1], [0, 0, 1, 1], [], []>} : vector<16x512xbf16>, vector<512x128xbf16>, vector<16x128xf32> -> vector<16x128xf32>
    %c0_60 = arith.constant 0 : index
    %c0_61 = arith.constant 0 : index
    %c0_62 = arith.constant 0 : index
    %144 = vector.load %arg18[%c0_60, %c0_61, %c0_62] : memref<1x1x128xf32, #tpu.memory_space<vmem>>, vector<1x1x128xf32>
    %145 = vector.shape_cast %144 : vector<1x1x128xf32> to vector<1x128xf32>
    %146 = vector.broadcast %145 : vector<1x128xf32> to vector<16x128xf32>
    %147 = arith.addf %143, %146 : vector<16x128xf32>
    %148 = arith.addf %92, %147 : vector<16x128xf32>
    %c0_63 = arith.constant 0 : index
    %c0_64 = arith.constant 0 : index
    %149 = vector.load %arg22[%c0_63, %c0_64] : memref<16x128xf32, #tpu.memory_space<vmem>>, vector<16x128xf32>
    tpu.vector_store %arg22[%c0_63, %c0_64], %148 {strides = array<i32>} : memref<16x128xf32, #tpu.memory_space<vmem>>, vector<16x128xf32>,
    %c1_i32 = arith.constant 1 : i32
    %150 = arith.cmpi eq, %arg0, %c1_i32 : i32
    %151 = arith.extui %150 : i1 to i32
    %c0_i32_65 = arith.constant 0 : i32
    %152 = arith.cmpi ne, %151, %c0_i32_65 : i32
    scf.if %152 {
      %c0_66 = arith.constant 0 : index
      %c0_67 = arith.constant 0 : index
      %153 = vector.load %arg19[%c0_66, %c0_67] : memref<1x128xf32, #tpu.memory_space<vmem>>, vector<1x128xf32>
      %c0_68 = arith.constant 0 : index
      %c0_69 = arith.constant 0 : index
      %154 = vector.load %arg20[%c0_68, %c0_69] : memref<1x128xf32, #tpu.memory_space<vmem>>, vector<1x128xf32>
      %cst_70 = arith.constant dense<0.000000e+00> : vector<16xf32>
      %155 = vector.multi_reduction <add>, %148, %cst_70 [1] : vector<16x128xf32> to vector<16xf32>
      %156 = vector.shape_cast %155 : vector<16xf32> to vector<16x1xf32>
      %cst_71 = arith.constant 1.280000e+02 : f32
      %157 = vector.broadcast %cst_71 : f32 to vector<16x1xf32>
      %158 = arith.divf %156, %157 : vector<16x1xf32>
      %159 = vector.broadcast %158 : vector<16x1xf32> to vector<16x128xf32>
      %160 = arith.subf %148, %159 : vector<16x128xf32>
      %161 = arith.mulf %160, %160 : vector<16x128xf32>
      %cst_72 = arith.constant dense<0.000000e+00> : vector<16xf32>
      %162 = vector.multi_reduction <add>, %161, %cst_72 [1] : vector<16x128xf32> to vector<16xf32>
      %163 = vector.shape_cast %162 : vector<16xf32> to vector<16x1xf32>
      %cst_73 = arith.constant 1.280000e+02 : f32
      %164 = vector.broadcast %cst_73 : f32 to vector<16x1xf32>
      %165 = arith.divf %163, %164 : vector<16x1xf32>
      %166 = vector.broadcast %158 : vector<16x1xf32> to vector<16x128xf32>
      %167 = arith.subf %148, %166 : vector<16x128xf32>
      %cst_74 = arith.constant 9.99999997E-7 : f32
      %168 = vector.broadcast %cst_74 : f32 to vector<16x1xf32>
      %169 = arith.addf %165, %168 : vector<16x1xf32>
      %170 = math.rsqrt %169 : vector<16x1xf32>
      %171 = vector.broadcast %170 : vector<16x1xf32> to vector<16x128xf32>
      %172 = arith.mulf %167, %171 : vector<16x128xf32>
      %173 = vector.broadcast %153 : vector<1x128xf32> to vector<16x128xf32>
      %174 = arith.mulf %172, %173 : vector<16x128xf32>
      %175 = vector.broadcast %154 : vector<1x128xf32> to vector<16x128xf32>
      %176 = arith.addf %174, %175 : vector<16x128xf32>
      %177 = vector.shape_cast %176 : vector<16x128xf32> to vector<2x8x128xf32>
      %c0_75 = arith.constant 0 : index
      %c0_76 = arith.constant 0 : index
      %c0_77 = arith.constant 0 : index
      %178 = vector.load %arg21[%c0_75, %c0_76, %c0_77] : memref<2x8x128xf32, #tpu.memory_space<vmem>>, vector<2x8x128xf32>
      tpu.vector_store %arg21[%c0_75, %c0_76, %c0_77], %177 {strides = array<i32>} : memref<2x8x128xf32, #tpu.memory_space<vmem>>, vector<2x8x128xf32>,
    } else {
    }
    return
  }
  func.func @transform_0(%arg0: i32) -> (i32, i32) {
    %c0_i32 = arith.constant 0 : i32
    %c0_i32_0 = arith.constant 0 : i32
    %c0_i32_1 = arith.constant 0 : i32
    return %c0_i32, %c0_i32_0 : i32, i32
  }
  func.func @transform_1(%arg0: i32) -> (i32, i32) {
    %c0_i32 = arith.constant 0 : i32
    %c0_i32_0 = arith.constant 0 : i32
    %c0_i32_1 = arith.constant 0 : i32
    return %c0_i32, %c0_i32_0 : i32, i32
  }
  func.func @transform_2(%arg0: i32) -> (i32, i32) {
    %c0_i32 = arith.constant 0 : i32
    %c0_i32_0 = arith.constant 0 : i32
    %c0_i32_1 = arith.constant 0 : i32
    return %c0_i32, %c0_i32_0 : i32, i32
  }
  func.func @transform_3(%arg0: i32) -> (i32, i32, i32) {
    %c0_i32 = arith.constant 0 : i32
    %c0_i32_0 = arith.constant 0 : i32
    %c0_i32_1 = arith.constant 0 : i32
    %c0_i32_2 = arith.constant 0 : i32
    return %c0_i32, %c0_i32_0, %c0_i32_1 : i32, i32, i32
  }
  func.func @transform_4(%arg0: i32) -> (i32, i32, i32) {
    %c0_i32 = arith.constant 0 : i32
    %c0_i32_0 = arith.constant 0 : i32
    %c0_i32_1 = arith.constant 0 : i32
    %c0_i32_2 = arith.constant 0 : i32
    return %c0_i32, %c0_i32_0, %c0_i32_1 : i32, i32, i32
  }
  func.func @transform_5(%arg0: i32) -> (i32, i32, i32) {
    %c0_i32 = arith.constant 0 : i32
    %c0_i32_0 = arith.constant 0 : i32
    %c0_i32_1 = arith.constant 0 : i32
    %c0_i32_2 = arith.constant 0 : i32
    return %c0_i32, %c0_i32_0, %c0_i32_1 : i32, i32, i32
  }
  func.func @transform_6(%arg0: i32) -> (i32, i32, i32) {
    %c0_i32 = arith.constant 0 : i32
    %c0_i32_0 = arith.constant 0 : i32
    %c0_i32_1 = arith.constant 0 : i32
    return %arg0, %c0_i32, %c0_i32_0 : i32, i32, i32
  }
  func.func @transform_7(%arg0: i32) -> (i32, i32, i32) {
    %c0_i32 = arith.constant 0 : i32
    %c0_i32_0 = arith.constant 0 : i32
    %c0_i32_1 = arith.constant 0 : i32
    return %arg0, %c0_i32, %c0_i32_0 : i32, i32, i32
  }
  func.func @transform_8(%arg0: i32) -> (i32, i32, i32) {
    %c0_i32 = arith.constant 0 : i32
    %c0_i32_0 = arith.constant 0 : i32
    %c0_i32_1 = arith.constant 0 : i32
    return %arg0, %c0_i32, %c0_i32_0 : i32, i32, i32
  }
  func.func @transform_9(%arg0: i32) -> (i32, i32, i32) {
    %c0_i32 = arith.constant 0 : i32
    %c0_i32_0 = arith.constant 0 : i32
    %c0_i32_1 = arith.constant 0 : i32
    return %arg0, %c0_i32, %c0_i32_0 : i32, i32, i32
  }
  func.func @transform_10(%arg0: i32) -> (i32, i32, i32) {
    %c0_i32 = arith.constant 0 : i32
    %c0_i32_0 = arith.constant 0 : i32
    %c0_i32_1 = arith.constant 0 : i32
    return %arg0, %c0_i32, %c0_i32_0 : i32, i32, i32
  }
  func.func @transform_11(%arg0: i32) -> (i32, i32, i32) {
    %c0_i32 = arith.constant 0 : i32
    %c0_i32_0 = arith.constant 0 : i32
    %c0_i32_1 = arith.constant 0 : i32
    return %arg0, %c0_i32, %c0_i32_0 : i32, i32, i32
  }
  func.func @transform_12(%arg0: i32) -> (i32, i32, i32) {
    %c0_i32 = arith.constant 0 : i32
    %c0_i32_0 = arith.constant 0 : i32
    %c0_i32_1 = arith.constant 0 : i32
    return %arg0, %c0_i32, %c0_i32_0 : i32, i32, i32
  }
  func.func @transform_13(%arg0: i32) -> (i32, i32, i32) {
    %c0_i32 = arith.constant 0 : i32
    %c0_i32_0 = arith.constant 0 : i32
    %c0_i32_1 = arith.constant 0 : i32
    return %arg0, %c0_i32, %c0_i32_0 : i32, i32, i32
  }
  func.func @transform_14(%arg0: i32) -> (i32, i32, i32) {
    %c0_i32 = arith.constant 0 : i32
    %c0_i32_0 = arith.constant 0 : i32
    %c0_i32_1 = arith.constant 0 : i32
    return %arg0, %c0_i32, %c0_i32_0 : i32, i32, i32
  }
  func.func @transform_15(%arg0: i32) -> (i32, i32, i32) {
    %c0_i32 = arith.constant 0 : i32
    %c0_i32_0 = arith.constant 0 : i32
    %c0_i32_1 = arith.constant 0 : i32
    return %arg0, %c0_i32, %c0_i32_0 : i32, i32, i32
  }
  func.func @transform_16(%arg0: i32) -> (i32, i32, i32) {
    %c0_i32 = arith.constant 0 : i32
    %c0_i32_0 = arith.constant 0 : i32
    %c0_i32_1 = arith.constant 0 : i32
    return %arg0, %c0_i32, %c0_i32_0 : i32, i32, i32
  }
  func.func @transform_17(%arg0: i32) -> (i32, i32, i32) {
    %c0_i32 = arith.constant 0 : i32
    %c0_i32_0 = arith.constant 0 : i32
    %c0_i32_1 = arith.constant 0 : i32
    return %arg0, %c0_i32, %c0_i32_0 : i32, i32, i32
  }
  func.func @transform_18(%arg0: i32) -> (i32, i32) {
    %c0_i32 = arith.constant 0 : i32
    %c0_i32_0 = arith.constant 0 : i32
    %c0_i32_1 = arith.constant 0 : i32
    return %c0_i32, %c0_i32_0 : i32, i32
  }
  func.func @transform_19(%arg0: i32) -> (i32, i32) {
    %c0_i32 = arith.constant 0 : i32
    %c0_i32_0 = arith.constant 0 : i32
    %c0_i32_1 = arith.constant 0 : i32
    return %c0_i32, %c0_i32_0 : i32, i32
  }
  func.func @transform_20(%arg0: i32) -> (i32, i32, i32) {
    %c0_i32 = arith.constant 0 : i32
    %c0_i32_0 = arith.constant 0 : i32
    %c0_i32_1 = arith.constant 0 : i32
    %c0_i32_2 = arith.constant 0 : i32
    return %c0_i32, %c0_i32_0, %c0_i32_1 : i32, i32, i32
  }
}

</mosaic_0001>

<bundles_post_ra>
// kernel: backbone_forward.1
= control target key start
LH: loop header
LB: loop body
LE: loop exit
PB: predicated region body
PF: predicated region fallthrough
CT: control target
= control target key end

     0   :  { %s4620_s0 = inlined_call_operand.vmem [shape: f32[12,768], index: 0, kind: input, shape index: {}]   ;;  %s4621_s1 = inlined_call_operand.vmem [shape: bf16[768,128], index: 1, kind: input, shape index: {}]   ;;  %s4622_s2 = inlined_call_operand.vmem [shape: f32[1,128], index: 2, kind: input, shape index: {}]   ;;  %s4623_s3 = inlined_call_operand.vmem [shape: f32[1,1,128], index: 3, kind: input, shape index: {}]   ;;  %s4624_s4 = inlined_call_operand.vmem [shape: f32[1,1,128], index: 4, kind: input, shape index: {}]   ;;  %s4625_s5 = inlined_call_operand.vmem [shape: f32[1,8,128], index: 5, kind: input, shape index: {}]   ;;  %s4626_s6 = inlined_call_operand.vmem [shape: f32[2,1,128], index: 6, kind: input, shape index: {}]   ;;  %s4627_s7 = inlined_call_operand.vmem [shape: f32[2,1,128], index: 7, kind: input, shape index: {}]   ;;  %s4628_s8 = inlined_call_operand.vmem [shape: bf16[2,128,384], index: 8, kind: input, shape index: {}]   ;;  %s4629_s9 = inlined_call_operand.vmem [shape: f32[2,1,384], index: 9, kind: input, shape index: {}]   ;;  %s4630_s10 = inlined_call_operand.vmem [shape: bf16[2,128,128], index: 10, kind: input, shape index: {}]   ;;  %s4631_s11 = inlined_call_operand.vmem [shape: f32[2,1,128], index: 11, kind: input, shape index: {}]   ;;  %s4632_s12 = inlined_call_operand.vmem [shape: f32[2,1,128], index: 12, kind: input, shape index: {}]   ;;  %s4633_s13 = inlined_call_operand.vmem [shape: f32[2,1,128], index: 13, kind: input, shape index: {}]   ;;  %s4634_s14 = inlined_call_operand.vmem [shape: bf16[2,128,512], index: 14, kind: input, shape index: {}]   ;;  %s4635_s15 = inlined_call_operand.vmem [shape: f32[2,1,512], index: 15, kind: input, shape index: {}]   ;;  %s4636_s16 = inlined_call_operand.vmem [shape: bf16[2,512,128], index: 16, kind: input, shape index: {}]   ;;  %s4637_s17 = inlined_call_operand.vmem [shape: f32[2,1,128], index: 17, kind: input, shape index: {}]   ;;  %s4638_s18 = inlined_call_operand.vmem [shape: f32[1,128], index: 18, kind: input, shape index: {}]   ;;  %s4639_s19 = inlined_call_operand.vmem [shape: f32[1,128], index: 19, kind: input, shape index: {}]   ;;  %s4640_s20 = inlined_call_operand.vmem [shape: f32[2,8,128], index: 20, kind: output, shape index: {}]  }
   0x1   :  { %4645 = sst [smem:[#allocation4_spill]] %s4620_s0 }
   0x2   :  { %4646 = sst [smem:[#allocation5_spill]] %s4621_s1  ;;  %s4002_s1 = smov 0  }
   0x3   :  { %4647 = sst [smem:[#allocation6_spill]] %s4622_s2 }
   0x4   :  { %4648 = sst [smem:[#allocation7_spill]] %s4623_s3 }
   0x5   :  { %4649 = sst [smem:[#allocation8_spill]] %s4624_s4 }
   0x6   :  { %4650 = sst [smem:[#allocation9_spill]] %s4627_s7 }
   0x7   :  { %4651 = sst [smem:[#allocation10_spill]] %s4628_s8 }
   0x8   :  { %4652 = sst [smem:[#allocation11_spill]] %s4630_s10 }
   0x9   :  { %4653 = sst [smem:[#allocation12_spill]] %s4638_s18 }
   0xa   :  { %4654 = sst [smem:[#allocation13_spill]] %s4639_s19 }
   0xb   :  { %4655 = sst [smem:[#allocation14_spill]] %s4640_s20 }
   0xc LB: > { %4656 = sst [smem:[#allocation3_spill]] %s3890_s1  ;;  %s4008_s22 = sadd.s32 4294967295, %s3890_s1   ;;  %s3890_s1 = sphi %s4002_s1, %s30_s1  }
   0xd   : > { %p3241_p0 = scmp.ge.s32.totalorder %s3890_s1, 1  ;;  %p653_p1 = scmp.lt.s32.totalorder %s3890_s1, 3 }
   0xf   : > { %p654_p2 = pnand %p3241_p0, %p653_p1 }
  0x10   : > { %p747_p3 = scmp.lt.s32.totalorder (!%p654_p2), %s4008_s22, 1  ;;  %s4658_s10 = sld [smem:[#allocation11_spill]] (!%p654_p2) }
  0x11   : > { %657 = sbr.rel (%p654_p2) target bundleno = 3610 (0xe1a), region = 100  ;;  %s4659_s8 = sld [smem:[#allocation10_spill]] (!%p654_p2) }
  0x12   : > { %p3250_p4 = scmp.ne.s32.totalorder (!%p654_p2), %s4008_s22, 0 }
  0x18   : > { %s4014_s23 = scalar_select %p747_p3, %s4008_s22, 1 }
  0x19   : > { %797 = sbr.rel (%p3250_p4) target bundleno = 336 (0x150), region = 104  ;;  %s4661_s18 = sld [smem:[#allocation4_spill]] (!%p3250_p4)  ;;  %vm1401_vm0 = vcmask (!%p3250_p4), 1040384   ;;  %vm1403_vm1 = vcmask (!%p3250_p4), 1041408  }
  0x1a   : > { %s3652_s28 = smul.u32 192, %s4014_s23  ;;  %s3417_s4 = sshll.u32 %s4014_s23, 6 }
  0x1b   : > { %s3653_s29 = smul.u32 3, %s4014_s23  ;;  %s4030_s21 = scalar_lea.vmem %s4658_s10, %s3417_s4 }
  0x1c   : > { %s4035_s1 = scalar_lea.vmem %s4659_s8, %s3652_s28  ;;  %s3418_s24 = sshll.u32 %s4014_s23, 8 }
  0x1d   : > { %s4044_s27 = scalar_lea.vmem %s4629_s9, %s3653_s29  ;;  %s4058_s8 = scalar_lea.vmem %s4634_s14, %s3418_s24 }
  0x1e   : > { %s3247_s20 = sshll.u32 %s4014_s23, 2  ;;  %s4069_s7 = scalar_lea.vmem %s4636_s16, %s3418_s24 }
  0x1f   : > { %s4064_s29 = scalar_lea.vmem %s4635_s15, %s3247_s20  ;;  %s792_s0 = scalar_lea.vmem %s4637_s17, %s4014_s23  ;;  %v799_v31 = vld [vmem:[%s4661_s18 + $0x8] sm:$0xff] (!%p3250_p4)  ;;  %v805_v32 = vld [vmem:[%s4661_s18 + $0x38] sm:$0xf] (!%p3250_p4)  ;;  %v798_v35 = vld [vmem:[%s4661_s18] sm:$0xff] (!%p3250_p4) }
  0x20   : > { %s4660_s10 = sld [smem:[#allocation5_spill]]  ;;  %v811_v33 = vpack.c.bf16 %v805_v32, %v799_v31  ;;  %v804_v36 = vld [vmem:[%s4661_s18 + $0x30] sm:$0xf]  ;;  %v801_v39 = vld [vmem:[%s4661_s18 + $0x18] sm:$0xff]  ;;  %v807_v40 = vld [vmem:[%s4661_s18 + $0x48] sm:$0xf] }
  0x21   : > { %v810_v37 = vpack.c.bf16 %v804_v36, %v798_v35  ;;  %v813_v41 = vpack.c.bf16 %v807_v40, %v801_v39  ;;  %v800_v43 = vld [vmem:[%s4661_s18 + $0x10] sm:$0xff]  ;;  %v806_v44 = vld [vmem:[%s4661_s18 + $0x40] sm:$0xf]  ;;  %v803_v55 = vld [vmem:[%s4661_s18 + $0x28] sm:$0xff]  ;;  %s4662_s3 = sld [smem:[#allocation6_spill]]  ;;  %s4663_s28 = sld [smem:[#allocation7_spill]] }
  0x22   : > { %1239 = vmatprep.mubr.bf16.mxu0 %v811_v33  ;;  %v812_v45 = vpack.c.bf16 %v806_v44, %v800_v43  ;;  %v809_v56 = vld [vmem:[%s4661_s18 + $0x58] sm:$0xf]  ;;  %v802_v63 = vld [vmem:[%s4661_s18 + $0x20] sm:$0xff]  ;;  %s4664_s19 = sld [smem:[#allocation8_spill]] }
  0x23   : > { %1280 = vmatprep.mubr.bf16.mxu1 %v813_v41  ;;  %v815_v57 = vpack.c.bf16 %v809_v56, %v803_v55 }
  0x26   : > { %v3667_v0 = vld [vmem:[%s4660_s10 + $0x40] sm:$0xff]   ;;  %v3671_v4 = vld [vmem:[%s4660_s10 + $0x48] sm:$0xff]   ;;  %v3675_v8 = vld [vmem:[%s4660_s10 + $0x50] sm:$0xff]  }
  0x27   : > { %v3668_v1 = vld [vmem:[%s4660_s10] sm:$0xff]   ;;  %3420 = vmatprep.subr.bf16.mxu0 %v3667_v0  ;;  %v3672_v5 = vld [vmem:[%s4660_s10 + $0x8] sm:$0xff]   ;;  %v3676_v9 = vld [vmem:[%s4660_s10 + $0x10] sm:$0xff]  }
  0x28   : > { %v3669_v2 = vld [vmem:[%s4660_s10 + $0xc0] sm:$0xff]   ;;  %3421 = vmatpush3.bf16.msra.mxu0 %v3668_v1  ;;  %v3673_v6 = vld [vmem:[%s4660_s10 + $0xc8] sm:$0xff]   ;;  %v3677_v10 = vld [vmem:[%s4660_s10 + $0xd0] sm:$0xff]  }
  0x29   : > { %v3670_v3 = vld [vmem:[%s4660_s10 + $0x80] sm:$0xff]   ;;  %3442 = vmatprep.subr.bf16.mxu1 %v3669_v2  ;;  %3422 = vmatprep.subr.bf16.mxu0 %v3671_v4  ;;  %v3674_v7 = vld [vmem:[%s4660_s10 + $0x88] sm:$0xff]   ;;  %v3678_v11 = vld [vmem:[%s4660_s10 + $0x90] sm:$0xff]  }
  0x2a   : > { %3443 = vmatpush3.bf16.msra.mxu1 %v3670_v3  ;;  %v3679_v12 = vld [vmem:[%s4660_s10 + $0x58] sm:$0xff]   ;;  %v3683_v16 = vld [vmem:[%s4660_s10 + $0x60] sm:$0xff]   ;;  %v3687_v20 = vld [vmem:[%s4660_s10 + $0x68] sm:$0xff]  }
  0x2b   : > { %3444 = vmatprep.subr.bf16.mxu1 %v3673_v6  ;;  %v3680_v13 = vld [vmem:[%s4660_s10 + $0x18] sm:$0xff]   ;;  %v3684_v17 = vld [vmem:[%s4660_s10 + $0x20] sm:$0xff]   ;;  %v3688_v21 = vld [vmem:[%s4660_s10 + $0x28] sm:$0xff]  }
  0x2c   : > { %3423 = vmatpush3.bf16.msra.mxu0 %v3672_v5  ;;  %v3681_v14 = vld [vmem:[%s4660_s10 + $0xd8] sm:$0xff]   ;;  %v3685_v18 = vld [vmem:[%s4660_s10 + $0xe0] sm:$0xff]   ;;  %v3689_v22 = vld [vmem:[%s4660_s10 + $0xe8] sm:$0xff]  }
  0x2d   : > { %3424 = vmatprep.subr.bf16.mxu0 %v3675_v8  ;;  %v3682_v15 = vld [vmem:[%s4660_s10 + $0x98] sm:$0xff]   ;;  %v3686_v19 = vld [vmem:[%s4660_s10 + $0xa0] sm:$0xff]   ;;  %v3690_v23 = vld [vmem:[%s4660_s10 + $0xa8] sm:$0xff]  }
  0x2e   : > { %3445 = vmatpush3.bf16.msra.mxu1 %v3674_v7  ;;  %v3691_v24 = vld [vmem:[%s4660_s10 + $0x70] sm:$0xff]   ;;  %v3695_v28 = vld [vmem:[%s4660_s10 + $0x78] sm:$0xff]   ;;  %v3699_v38 = vld [vmem:[%s4660_s10 + $0x140] sm:$0xff]  }
  0x2f   : > { %3446 = vmatprep.subr.bf16.mxu1 %v3677_v10  ;;  %v3692_v25 = vld [vmem:[%s4660_s10 + $0x30] sm:$0xff]   ;;  %v3696_v29 = vld [vmem:[%s4660_s10 + $0x38] sm:$0xff]   ;;  %v3700_v42 = vld [vmem:[%s4660_s10 + $0x100] sm:$0xff]  }
  0x30   : > { %3425 = vmatpush3.bf16.msra.mxu0 %v3676_v9  ;;  %v3693_v26 = vld [vmem:[%s4660_s10 + $0xf0] sm:$0xff]   ;;  %v3697_v30 = vld [vmem:[%s4660_s10 + $0xf8] sm:$0xff]   ;;  %v3701_v46 = vld [vmem:[%s4660_s10 + $0x148] sm:$0xff]  }
  0x31   : > { %3426 = vmatprep.subr.bf16.mxu0 %v3679_v12  ;;  %v3694_v27 = vld [vmem:[%s4660_s10 + $0xb0] sm:$0xff]   ;;  %v3698_v34 = vld [vmem:[%s4660_s10 + $0xb8] sm:$0xff]   ;;  %v3702_v47 = vld [vmem:[%s4660_s10 + $0x108] sm:$0xff]  }
  0x32   : > { %3447 = vmatpush3.bf16.msra.mxu1 %v3678_v11  ;;  %v3703_v48 = vld [vmem:[%s4660_s10 + $0x150] sm:$0xff]   ;;  %v3705_v50 = vld [vmem:[%s4660_s10 + $0x158] sm:$0xff]   ;;  %v3707_v52 = vld [vmem:[%s4660_s10 + $0x160] sm:$0xff]  }
  0x33   : > { %3448 = vmatprep.subr.bf16.mxu1 %v3681_v14  ;;  %v3704_v49 = vld [vmem:[%s4660_s10 + $0x110] sm:$0xff]   ;;  %v3706_v51 = vld [vmem:[%s4660_s10 + $0x118] sm:$0xff]   ;;  %v3708_v53 = vld [vmem:[%s4660_s10 + $0x120] sm:$0xff]  }
  0x34   : > { %3427 = vmatpush3.bf16.msra.mxu0 %v3680_v13  ;;  %v3709_v54 = vld [vmem:[%s4660_s10 + $0x168] sm:$0xff]   ;;  %v3711_v59 = vld [vmem:[%s4660_s10 + $0x170] sm:$0xff]   ;;  %v3713_v61 = vld [vmem:[%s4660_s10 + $0x178] sm:$0xff]  }
  0x35   : > { %3428 = vmatprep.subr.bf16.mxu0 %v3683_v16  ;;  %v3710_v58 = vld [vmem:[%s4660_s10 + $0x128] sm:$0xff]   ;;  %v3712_v60 = vld [vmem:[%s4660_s10 + $0x130] sm:$0xff]   ;;  %v3714_v62 = vld [vmem:[%s4660_s10 + $0x138] sm:$0xff]  }
  0x36   : > { %3449 = vmatpush3.bf16.msra.mxu1 %v3682_v15  ;;  %v808_v0 = vld [vmem:[%s4661_s18 + $0x50] sm:$0xf]  ;;  %v3251_v3 = vld [vmem:[%s4662_s3] ss:$0 sm:$0xff] }
  0x37   : > { %3450 = vmatprep.subr.bf16.mxu1 %v3685_v18  ;;  %v814_v1 = vpack.c.bf16 %v808_v0, %v802_v63  ;;  %v1357_v39 = vld [vmem:[%s4663_s28] sm:$0x1] }
  0x38   : > { %3429 = vmatpush3.bf16.msra.mxu0 %v3684_v17  ;;  %v3300_v40 = vld [vmem:[%s4664_s19] ss:$0 sm:$0xff] }
  0x39   : > { %3430 = vmatprep.subr.bf16.mxu0 %v3687_v20 }
  0x3a   : > { %3451 = vmatpush3.bf16.msra.mxu1 %v3686_v19  ;;  %v3892_v19 = vmov 1983009808  }
  0x3b   : > { %3452 = vmatprep.subr.bf16.mxu1 %v3689_v22  ;;  %v1334_v20 = vunpack.c.l.s4 %v3892_v19 }
  0x3c   : > { %3431 = vmatpush3.bf16.msra.mxu0 %v3688_v21  ;;  %v1336_v21 = vlaneseq }
  0x3d   : > { %3432 = vmatprep.subr.bf16.mxu0 %v3691_v24  ;;  %v1335_v22 = vunpack.c.0.s8 %v1334_v20 }
  0x3e   : > { %3453 = vmatpush3.bf16.msra.mxu1 %v3690_v23  ;;  %v1337_v23 = vshrl.u32 %v1336_v21, 7 }
  0x3f   : > { %3454 = vmatprep.subr.bf16.mxu1 %v3693_v26 }
  0x40   : > { %3433 = vmatpush3.bf16.msra.mxu0 %v3692_v25 }
  0x41   : > { %3434 = vmatprep.subr.bf16.mxu0 %v3695_v28 }
  0x42   : > { %3455 = vmatpush3.bf16.msra.mxu1 %v3694_v27  ;;  %v1338_v27 = vsub.s32 %v1335_v22, %v1337_v23 }
  0x43   : > { %3456 = vmatprep.subr.bf16.mxu1 %v3697_v30 }
  0x44   : > { %3435 = vmatpush3.bf16.msra.mxu0 %v3696_v29 }
  0x45   : > { %3464 = vmatprep.subr.bf16.mxu0 %v3699_v38 }
  0x46   : > { %3457 = vmatpush3.bf16.msra.mxu1 %v3698_v34 }
  0x47   : > { %1240 = vmatmul.mubr.bf16.vlgmr.msra.gmra.mrb[0].mxu0 %v810_v37 }
  0x48   : > { %3465 = vmatpush3.bf16.msra.mxu0 %v3700_v42  ;;  %1321 = vmatprep.mubr.bf16.mxu0 %v815_v57 }
  0x49   : > { %1281 = vmatmul.mubr.bf16.vlgmr.msra.gmra.mrb[0].mxu1 %v812_v45  ;;  %3466 = vmatprep.subr.bf16.mxu0 %v3701_v46 }
  0x4c   : > { %3467 = vmatpush3.bf16.msra.mxu0 %v3702_v47  ;;  %v1402_v47 = vsel %vm1401_vm0, %v1357_v39, %v3300_v40 }
  0x4d   : > { %3468 = vmatprep.subr.bf16.mxu0 %v3703_v48 }
  0x50   : > { %3469 = vmatpush3.bf16.msra.mxu0 %v3704_v49 }
  0x51   : > { %3470 = vmatprep.subr.bf16.mxu0 %v3705_v50  ;;  %v1406_v50 = vld [vmem:[%s4625_s5] sm:$0xff] }
  0x54   : > { %3471 = vmatpush3.bf16.msra.mxu0 %v3706_v51 }
  0x55   : > { %3472 = vmatprep.subr.bf16.mxu0 %v3707_v52 }
  0x58   : > { %3473 = vmatpush3.bf16.msra.mxu0 %v3708_v53 }
  0x59   : > { %3474 = vmatprep.subr.bf16.mxu0 %v3709_v54 }
  0x5c   : > { %3475 = vmatpush3.bf16.msra.mxu0 %v3710_v58 }
  0x5d   : > { %3476 = vmatprep.subr.bf16.mxu0 %v3711_v59 }
  0x60   : > { %3477 = vmatpush3.bf16.msra.mxu0 %v3712_v60 }
  0x61   : > { %3478 = vmatprep.subr.bf16.mxu0 %v3713_v61 }
  0x64   : > { %3479 = vmatpush3.bf16.msra.mxu0 %v3714_v62 }
  0x67   : > { %1322 = vmatmul.mubr.bf16.vlgmr.msra.gmra.mrb[4].mxu0 %v814_v1 }
 0x11a   : > { %v3436_v2 = vpop.f32.mrb[0].mxu0 }
 0x11b   : > { %v3437_v4 = vpop.f32.mrb[1].mxu0 }
 0x11c   : > { %v3438_v5 = vadd.f32 %v3437_v4, %v3436_v2  ;;  %v3439_v6 = vpop.f32.mrb[2].mxu0  ;;  %v3458_v7 = vpop.f32.mrb[0].mxu1 }
 0x11d   : > { %v3440_v8 = vpop.f32.mrb[3].mxu0  ;;  %v3459_v11 = vpop.f32.mrb[1].mxu1 }
 0x11e   : > { %v1242_v9 = vadd.f32 %v3438_v5, %v3251_v3  ;;  %v3441_v10 = vadd.f32 %v3440_v8, %v3439_v6  ;;  %v3460_v12 = vadd.f32 %v3459_v11, %v3458_v7  ;;  %v3461_v13 = vpop.f32.mrb[2].mxu1 }
 0x11f   : > { %v3462_v15 = vpop.f32.mrb[3].mxu1 }
 0x120   : > { %v1245_v14 = vadd.f32 %v3441_v10, %v3251_v3  ;;  %v1283_v16 = vadd.f32 %v3460_v12, %v1242_v9  ;;  %v3463_v17 = vadd.f32 %v3462_v15, %v3461_v13 }
 0x122   : > { %v1286_v18 = vadd.f32 %v3463_v17, %v1245_v14 }
 0x13a   : > { %v3480_v24 = vpop.f32.mrb[4].mxu0 }
 0x13b   : > { %v3481_v25 = vpop.f32.mrb[5].mxu0 }
 0x13c   : > { %v3482_v26 = vadd.f32 %v3481_v25, %v3480_v24  ;;  %v3483_v28 = vpop.f32.mrb[6].mxu0 }
 0x13d   : > { %v3484_v29 = vpop.f32.mrb[7].mxu0 }
 0x13e   : > { %v1324_v30 = vadd.f32 %v3482_v26, %v1283_v16  ;;  %v3485_v31 = vadd.f32 %v3484_v29, %v3483_v28 }
 0x140   : > { %v1332_v32 = vcombine.high %v1324_v30, %v1324_v30  ;;  %v1339_v33 = vrot.slane %v1324_v30, %v1338_v27  ;;  %v1327_v34 = vadd.f32 %v3485_v31, %v1286_v18 }
 0x142   : > { %v1346_v35 = vrot.slane %v1332_v32, %v1338_v27  ;;  %v1347_v36 = vcombine.high %v1339_v33, %v1339_v33  ;;  %v1365_v37 = vcombine.low %v1339_v33, %v1339_v33  ;;  %v1355_v38 = vrot.slane %v1327_v34, %v1338_v27 }
 0x144   : > { %v1366_v41 = vcombine.low %v1347_v36, %v1346_v35  ;;  %v3301_v42 = vcombine.high %v1346_v35, %v1346_v35  ;;  %v1356_v43 = vcombine.high %v1355_v38, %v1355_v38  ;;  %v1373_v44 = vrot.slane %v1365_v37, %v1338_v27 }
 0x146   : > { %v1380_v45 = vrot.slane %v1366_v41, %v1338_v27  ;;  %v1383_v46 = vcombine.low %v1355_v38, %v1356_v43  ;;  %v1390_v49 = vrot.slane %v3301_v42, %v1338_v27 }
 0x148   : > { %v1381_v48 = vcombine.low %v1373_v44, %v1380_v45  ;;  %v1397_v51 = vrot.slane %v1383_v46, %v1338_v27 }
 0x14a   : > { %v1404_v52 = vsel %vm1403_vm1, %v1402_v47, %v1381_v48  ;;  %v1398_v53 = vcombine.low %v1390_v49, %v1397_v51 }
 0x14b   : > { %v1407_v54 = vadd.f32 %v1406_v50, %v1404_v52 }
 0x14c   : > { %v1405_v55 = vsel %vm1403_vm1, %v1402_v47, %v1398_v53 }
 0x14d   : > { %1409 = vst [vmem:[#allocation2] sm:$0xff] %v1407_v54  ;;  %v1408_v56 = vadd.f32 %v1406_v50, %v1405_v55 }
 0x14f   : > { %1410 = vst [vmem:[#allocation2 + $0x8] sm:$0xff] %v1408_v56 }
 0x150 PF: > { %v3720_v59 = vld [vmem:[%s4035_s1 + $0x4] ss:$12 sps:$4 sm:$0xff]   ;;  %v3722_v60 = vld [vmem:[%s4035_s1] ss:$12 sps:$4 sm:$0xff]   ;;  %v3893_v61 = vmov 0.0   ;;  %v3894_v23 = vmov 0   ;;  %s4665_s3 = scalar_lea.vmem %s4626_s6, %s4014_s23  ;;  %v1489_v46 = vlaneseq  ;;  %s4668_s19 = scalar_lea.vmem %s4631_s11, %s4014_s23 }
 0x151   : > { %3564 = vmatprep.subr.bf16.mxu1 %v3893_v61  ;;  %v3723_v62 = vld [vmem:[%s4035_s1 + $0x8] ss:$12 sps:$4 sm:$0xff]   ;;  %1632 = vmatprep.subr.bf16.mxu0 %v3720_v59  ;;  %v3726_v8 = vld [vmem:[%s4035_s1 + $0x18] ss:$12 sps:$4 sm:$0xff]   ;;  %v3727_v9 = vld [vmem:[%s4035_s1 + $0x20] ss:$12 sps:$4 sm:$0xff]   ;;  %s4669_s25 = scalar_lea.vmem %s4632_s12, %s4014_s23 }
 0x152   : > { %v3724_v63 = vld [vmem:[%s4035_s1 + $0x1c] ss:$12 sps:$4 sm:$0xff]   ;;  %1633 = vmatpush1.bf16.msra.mxu0 %v3722_v60  ;;  %3565 = vmatpush3.bf16.msra.mxu1 %v3723_v62  ;;  %v3728_v10 = vld [vmem:[%s4035_s1 + $0x34] ss:$12 sps:$4 sm:$0xff]   ;;  %v3731_v12 = vld [vmem:[%s4035_s1 + $0x38] ss:$12 sps:$4 sm:$0xff]  }
 0x153   : > { %1634 = vmatprep.subr.bf16.mxu0 %v3724_v63  ;;  %3566 = vmatprep.subr.bf16.mxu1 %v3893_v61  ;;  %v3730_v11 = vld [vmem:[%s4035_s1 + $0x30] ss:$12 sps:$4 sm:$0xff]   ;;  %v3732_v13 = vld [vmem:[%s4035_s1 + $0x4c] ss:$12 sps:$4 sm:$0xff]   ;;  %v3734_v14 = vld [vmem:[%s4035_s1 + $0x48] ss:$12 sps:$4 sm:$0xff]  }
 0x154   : > { %v4268_v57 = vld [vmem:[#allocation2] sm:$0xff]  ;;  %v3735_v15 = vld [vmem:[%s4035_s1 + $0x50] ss:$12 sps:$4 sm:$0xff]   ;;  %v3739_v18 = vld [vmem:[%s4035_s1 + $0x68] ss:$12 sps:$4 sm:$0xff]   ;;  %1664 = vmatprep.mubr.bf16.mxu0 %v3894_v23  ;;  %vm3895_vm2 = vmmov 0  }
 0x155   : > { %1415 = vadd.xlane.f32.xlu0 %v4268_v57  ;;  %v3736_v16 = vld [vmem:[%s4035_s1 + $0x64] ss:$12 sps:$4 sm:$0xff]   ;;  %v3738_v17 = vld [vmem:[%s4035_s1 + $0x60] ss:$12 sps:$4 sm:$0xff]   ;;  %v3740_v19 = vld [vmem:[%s4035_s1 + $0x7c] ss:$12 sps:$4 sm:$0xff]   ;;  %3580 = vmatprep.mubr.msk.bf16.mxu1 %vm3895_vm2, %v3893_v61 }
 0x156   : > { %v4270_v58 = vld [vmem:[#allocation2 + $0x8] sm:$0xff]  ;;  %1635 = vmatpush1.bf16.msra.mxu0 %v3726_v8  ;;  %3567 = vmatpush3.bf16.msra.mxu1 %v3727_v9  ;;  %v3742_v20 = vld [vmem:[%s4035_s1 + $0x78] ss:$12 sps:$4 sm:$0xff]   ;;  %v3744_v22 = vld [vmem:[%s4035_s1 + $0x94] ss:$12 sps:$4 sm:$0xff]   ;;  %s4666_s28 = sld [smem:[#allocation9_spill]] }
 0x157   : > { %3568 = vmatprep.subr.bf16.mxu1 %v3893_v61  ;;  %1636 = vmatprep.subr.bf16.mxu0 %v3728_v10  ;;  %v3743_v21 = vld [vmem:[%s4035_s1 + $0x80] ss:$12 sps:$4 sm:$0xff]   ;;  %v3746_v24 = vld [vmem:[%s4035_s1 + $0x90] ss:$12 sps:$4 sm:$0xff]   ;;  %v3747_v25 = vld [vmem:[%s4035_s1 + $0x98] ss:$12 sps:$4 sm:$0xff]  }
 0x158   : > { %v3748_v26 = vld [vmem:[%s4035_s1 + $0xac] ss:$12 sps:$4 sm:$0xff]   ;;  %v3750_v27 = vld [vmem:[%s4035_s1 + $0xa8] ss:$12 sps:$4 sm:$0xff]   ;;  %v3751_v28 = vld [vmem:[%s4035_s1 + $0xb0] ss:$12 sps:$4 sm:$0xff]  }
 0x159   : > { %1417 = vadd.xlane.f32.xlu0 %v4270_v58  ;;  %v3302_v37 = vld [vmem:[%s4665_s3] ss:$0 sm:$0xff]  ;;  %v4337_v47 = vshrl.u32 %v1489_v46, 7  ;;  %vm1722_vm3 = vcmask 523264   ;;  %vm1843_vm4 = vcmask 1043456   ;;  %vm1815_vm5 = vcmask 64512   ;;  %s4670_s3 = scalar_lea.vmem %s4633_s13, %s4014_s23 }
 0x15a   : > { %1637 = vmatpush1.bf16.msra.mxu0 %v3730_v11  ;;  %3569 = vmatpush3.bf16.msra.mxu1 %v3731_v12  ;;  %v1487_v49 = vld [vmem:[%s4044_s27] sm:$0x7]  ;;  %s3896_s27 = smov 64   ;;  %p3412_p5 = scmp.ne.s32.totalorder %s4008_s22, 1 }
 0x15b   : > { %3570 = vmatprep.subr.bf16.mxu1 %v3893_v61  ;;  %1638 = vmatprep.subr.bf16.mxu0 %v3732_v13  ;;  %v1495_v48 = vsub.s32 1, %v4337_v47  ;;  %v1499_v50 = vsub.s32 2, %v4337_v47  ;;  %v1491_v52 = vsub.s32 0, %v4337_v47 }
 0x15c   : > { %s4667_s30 = scalar_lea.vmem %s4666_s28, %s4014_s23  ;;  %s4672_s28 = sld [smem:[#allocation13_spill]] (!%p3412_p5) }
 0x15d   : > { %v3303_v41 = vld [vmem:[%s4667_s30] ss:$0 sm:$0xff]  ;;  %v1496_v51 = vrot.slane %v1487_v49, %v1495_v48  ;;  %v1500_v55 = vrot.slane %v1487_v49, %v1499_v50 }
 0x15e   : > { %1639 = vmatpush1.bf16.msra.mxu0 %v3734_v14  ;;  %3571 = vmatpush3.bf16.msra.mxu1 %v3735_v15 }
 0x15f   : > { %3572 = vmatprep.subr.bf16.mxu1 %v3893_v61  ;;  %1640 = vmatprep.subr.bf16.mxu0 %v3736_v16 }
 0x162   : > { %1641 = vmatpush1.bf16.msra.mxu0 %v3738_v17  ;;  %3573 = vmatpush3.bf16.msra.mxu1 %v3739_v18 }
 0x163   : > { %1642 = vmatprep.subr.bf16.mxu0 %v3740_v19  ;;  %3574 = vmatprep.subr.bf16.mxu1 %v3893_v61 }
 0x166   : > { %1643 = vmatpush1.bf16.msra.mxu0 %v3742_v20  ;;  %3575 = vmatpush3.bf16.msra.mxu1 %v3743_v21 }
 0x167   : > { %1644 = vmatprep.subr.bf16.mxu0 %v3744_v22  ;;  %3576 = vmatprep.subr.bf16.mxu1 %v3893_v61 }
 0x16a   : > { %1645 = vmatpush1.bf16.msra.mxu0 %v3746_v24  ;;  %3577 = vmatpush3.bf16.msra.mxu1 %v3747_v25 }
 0x16b   : > { %1646 = vmatprep.subr.bf16.mxu0 %v3748_v26  ;;  %3578 = vmatprep.subr.bf16.mxu1 %v3893_v61 }
 0x16e   : > { %1647 = vmatpush1.bf16.msra.mxu0 %v3750_v27  ;;  %3579 = vmatpush3.bf16.msra.mxu1 %v3751_v28 }
 0x16f   : > { %3584 = vmatprep.subr.bf16.mxu1 %v3893_v61  ;;  %3608 = vmatprep.subr.bf16.mxu0 %v3893_v61 }
 0x1e2   : > { %v1416_v0 = vpop.xlane.xlu0 %1415 }
 0x1e3   : > { %v1420_v1 = vmul.f32 0.0078125, %v1416_v0 }
 0x1e5   : > { %v4281_v2 = vsub.f32 %v4268_v57, %v1420_v1 }
 0x1e6   : > { %v1418_v3 = vpop.xlane.xlu0 %1417 }
 0x1e7   : > { %v1421_v4 = vmul.f32 0.0078125, %v1418_v3  ;;  %v1424_v5 = vmul.f32 %v4281_v2, %v4281_v2  ;;  %v1492_v3 = vrot.slane %v1487_v49, %v1491_v52 }
 0x1e9   : > { %v4286_v6 = vsub.f32 %v4270_v58, %v1421_v4  ;;  %1426 = vadd.xlane.f32.xlu1 %v1424_v5 }
 0x1eb   : > { %v1425_v7 = vmul.f32 %v4286_v6, %v4286_v6 }
 0x1ed   : > { %1428 = vadd.xlane.f32.xlu1 %v1425_v7 }
 0x276   : > { %v1427_v29 = vpop.xlane.xlu1 %1426 }
 0x277   : > { %v1430_v30 = vmul.f32 0.0078125, %v1427_v29 }
 0x279   : > { %v1432_v31 = vadd.f32 1e-06, %v1430_v30 }
 0x27a   : > { %v1429_v32 = vpop.xlane.xlu1 %1428 }
 0x27b   : > { %3840 = vrsqrt.f32 %v1432_v31  ;;  %v1431_v33 = vmul.f32 0.0078125, %v1429_v32 }
 0x27d   : > { %v1433_v34 = vadd.f32 1e-06, %v1431_v33 }
 0x27f   : > { %3842 = vrsqrt.f32 %v1433_v34 }
 0x285   : > { %v3841_v35 = vpop.eup %3840 }
 0x286   : > { %v1436_v36 = vmul.f32 %v3841_v35, %v4281_v2 }
 0x288   : > { %v1444_v40 = vmul.f32 %v3302_v37, %v1436_v36 }
 0x289   : > { %v3843_v38 = vpop.eup %3842 }
 0x28a   : > { %v1437_v39 = vmul.f32 %v3843_v38, %v4286_v6  ;;  %v1452_v43 = vadd.f32 %v3303_v41, %v1444_v40 }
 0x28c   : > { %v1445_v42 = vmul.f32 %v3302_v37, %v1437_v39 }
 0x28e   : > { %v1453_v44 = vadd.f32 %v3303_v41, %v1445_v42 }
 0x290   : > { %v1454_v45 = vpack.c.bf16 %v1453_v44, %v1452_v43 }
 0x292   : > { %1665 = vmatmul.mubr.bf16.vlgmr.msra.gmra.mrb[0].mxu0 %v1454_v45  ;;  %3581 = vmatmul.mubr.bf16.vlgmr.msra.gmra.mrb[0].mxu1 %v1454_v45 }
 0x293   : > { %3586 = vmatprep.mubr.msk.bf16.mxu1 %vm3895_vm2, %v3893_v61  ;;  %3610 = vmatprep.mubr.msk.bf16.mxu0 %vm3895_vm2, %v3893_v61 }
 0x365   : > { %v1666_v53 = vpop.f32.mrb[0].mxu0  ;;  %v1709_v54 = vpop.f32.mrb[0].mxu1 }
 0x366   : > { %v1668_v56 = vpop.f32.mrb[1].mxu0  ;;  %v3582_v59 = vpop.f32.mrb[1].mxu1  ;;  %v1667_v7 = vadd.f32 %v1666_v53, %v1492_v3  ;;  %v1710_v10 = vadd.f32 %v1709_v54, %v1500_v55 }
 0x367   : > { %v1669_v60 = vadd.f32 %v1668_v56, %v1496_v51  ;;  %v1670_v62 = vpop.f32.mrb[2].mxu0  ;;  %v1712_v63 = vpop.f32.mrb[2].mxu1 }
 0x368   : > { %v4347_v0 = vadd.f32 %v1712_v63, %v1500_v55  ;;  %v1672_v1 = vpop.f32.mrb[3].mxu0  ;;  %v3583_v2 = vpop.f32.mrb[3].mxu1  ;;  %v1716_v9 = vpack.c.bf16 %v1667_v7, %v1667_v7  ;;  %v1671_v12 = vadd.f32 %v1670_v62, %v1492_v3  ;;  %v4358_v13 = vpack.c.bf16 %v1710_v10, %v1710_v10 }
 0x369   : > { %v1718_v4 = vpack.c.bf16 %v1669_v60, %v1669_v60  ;;  %v1673_v6 = vadd.f32 %v1672_v1, %v1496_v51 }
 0x36a   : > { %v1717_v14 = vpack.c.bf16 %v1671_v12, %v1671_v12  ;;  %v1845_v15 = vsel %vm1843_vm4, %v4358_v13, 0  ;;  %v1721_v43 = vpack.c.bf16 %v4347_v0, %v4347_v0 }
 0x36b   : > { %v1727_v5 = vsel %vm1722_vm3, %v1718_v4, 0  ;;  %v1719_v8 = vpack.c.bf16 %v1673_v6, %v1673_v6 }
 0x36c   : > { %3585 = vmatpush3.bf16.xpose.msra.mxu1 %v1727_v5  ;;  %v1891_v49 = vsel %vm1843_vm4, %v1721_v43, 0 }
 0x36d   : > { %3590 = vmatprep.subr.bf16.mxu1 %v3893_v61  ;;  %v1773_v11 = vsel %vm1722_vm3, %v1719_v8, 0 }
 0x373   : > { %3587 = vmatmul.mubr.msk.bf16.vlgmr.msra.gmra.mrb[4].mxu1 %vm1722_vm3, %v1716_v9 }
 0x374   : > { %3591 = vmatpush3.bf16.xpose.msra.mxu1 %v1773_v11  ;;  %3592 = vmatprep.mubr.msk.bf16.mxu1 %vm3895_vm2, %v3893_v61 }
 0x375   : > { %3596 = vmatprep.subr.bf16.mxu1 %v3893_v61 }
 0x37b   : > { %3593 = vmatmul.mubr.msk.bf16.vlgmr.msra.gmra.mrb[8].mxu1 %vm1722_vm3, %v1717_v14 }
 0x37c   : > { %3597 = vmatpush3.bf16.msra.mxu1 %v1845_v15  ;;  %3598 = vmatprep.mubr.msk.bf16.mxu1 %vm3895_vm2, %v3893_v61 }
 0x37d   : > { %3602 = vmatprep.subr.bf16.mxu1 %v3893_v61 }
 0x446   : > { %v1763_v16 = vpop.f32.mrb[4].mxu1 }
 0x447   : > { %v3588_v17 = vpop.f32.mrb[5].mxu1  ;;  %v1816_v18 = vsel %vm1815_vm5, %v1763_v16, -inf }
 0x448   : > { %1817 = vmax.xlane.f32.xlu0 %v1816_v18  ;;  %v1766_v19 = vpop.f32.mrb[6].mxu1 }
 0x449   : > { %v3589_v20 = vpop.f32.mrb[7].mxu1 }
 0x44e   : > { %v1809_v21 = vpop.f32.mrb[8].mxu1 }
 0x44f   : > { %v3594_v22 = vpop.f32.mrb[9].mxu1  ;;  %v1819_v24 = vsel %vm1815_vm5, %v1809_v21, -inf }
 0x450   : > { %1820 = vmax.xlane.f32.xlu1 %v1819_v24  ;;  %v1812_v25 = vpop.f32.mrb[10].mxu1 }
 0x451   : > { %v3595_v26 = vpop.f32.mrb[11].mxu1 }
 0x461   : > { %1989 = vrot.lane.b32.xlu1 %v1719_v8, %s3896_s27 }
 0x4d5   : > { %v1818_v27 = vpop.xlane.xlu0 %1817 }
 0x4d6   : > { %v1822_v28 = vsub.f32 %v1763_v16, %v1818_v27 }
 0x4d8   : > { %v1824_v29 = vmul.f32 1.442695, %v1822_v28 }
 0x4da   : > { %3844 = vpow2.f32 %v1824_v29 }
 0x4dd   : > { %v1821_v30 = vpop.xlane.xlu1 %1820 }
 0x4de   : > { %v1823_v31 = vsub.f32 %v1809_v21, %v1821_v30 }
 0x4e0   : > { %v1826_v32 = vmul.f32 1.442695, %v1823_v31 }
 0x4e1   : > { %v1990_v38 = vpop.permute.xlu1 %1989 }
 0x4e2   : > { %3846 = vpow2.f32 %v1826_v32  ;;  %v1995_v55 = vsel %vm1722_vm3, %v1990_v38, 0  ;;  %v3753_v38 = vld [vmem:[%s4030_s21 + $0x8] sm:$0xff]  }
 0x4e4   : > { %v3845_v33 = vpop.eup %3844 }
 0x4e5   : > { %v1828_v34 = vsel %vm1815_vm5, %v3845_v33, 0.0 }
 0x4e6   : > { %1829 = vadd.xlane.f32.xlu0 %v1828_v34 }
 0x4ec   : > { %v3847_v35 = vpop.eup %3846 }
 0x4ed   : > { %v1831_v36 = vsel %vm1815_vm5, %v3847_v35, 0.0 }
 0x4ee   : > { %1832 = vadd.xlane.f32.xlu1 %v1831_v36 }
 0x4fc   : > { %1937 = vrot.lane.b32.xlu0 %v1718_v4, %s3896_s27 }
 0x4ff   : > { %1934 = vrot.lane.b32.xlu1 %v1716_v9, %s3896_s27 }
 0x503   : > { %1986 = vrot.lane.b32.xlu1 %v1717_v14, %s3896_s27 }
 0x573   : > { %v1830_v37 = vpop.xlane.xlu0 %1829 }
 0x574   : > { %3848 = vrcp.f32 %v1830_v37  ;;  %v3752_v37 = vld [vmem:[%s4030_s21] sm:$0xff]  }
 0x577   : > { %v1938_v39 = vpop.permute.xlu0 %1937 }
 0x578   : > { %v1943_v40 = vsel %vm1722_vm3, %v1938_v39, 0  ;;  %v3754_v39 = vld [vmem:[%s4030_s21 + $0x10] sm:$0xff]  }
 0x579   : > { %3609 = vmatpush3.bf16.xpose.msra.mxu0 %v1943_v40  ;;  %v3755_v40 = vld [vmem:[%s4030_s21 + $0x18] sm:$0xff]  }
 0x57a   : > { %3620 = vmatprep.subr.bf16.mxu0 %v3893_v61 }
 0x57b   : > { %v1833_v41 = vpop.xlane.xlu1 %1832 }
 0x57c   : > { %3850 = vrcp.f32 %v1833_v41  ;;  %v3756_v41 = vld [vmem:[%s4030_s21 + $0x20] sm:$0xff]  }
 0x57e   : > { %v3849_v42 = vpop.eup %3848 }
 0x57f   : > { %v1836_v44 = vmul.f32 %v3849_v42, %v3845_v33  ;;  %v1935_v45 = vpop.permute.xlu1 %1934  ;;  %v3757_v42 = vld [vmem:[%s4030_s21 + $0x28] sm:$0xff]  }
 0x580   : > { %3611 = vmatmul.mubr.msk.bf16.vlgmr.msra.gmra.mrb[4].mxu0 %vm1722_vm3, %v1935_v45 }
 0x581   : > { %v1838_v46 = vpack.c.bf16 %v1836_v44, %v1836_v44  ;;  %3622 = vmatprep.mubr.msk.bf16.mxu0 %vm3895_vm2, %v3893_v61  ;;  %v3759_v44 = vld [vmem:[%s4030_s21 + $0x38] sm:$0xff]  }
 0x583   : > { %3599 = vmatmul.mubr.msk.bf16.vlgmr.msra.gmra.mrb[12].mxu1 %vm1815_vm5, %v1838_v46  ;;  %v1987_v56 = vpop.permute.xlu1 %1986 }
 0x584   : > { %3603 = vmatpush3.bf16.msra.mxu1 %v1891_v49  ;;  %3604 = vmatprep.mubr.msk.bf16.mxu1 %vm3895_vm2, %v3893_v61 }
 0x585   : > { %3614 = vmatprep.subr.bf16.mxu1 %v3893_v61 }
 0x586   : > { %v3851_v51 = vpop.eup %3850 }
 0x587   : > { %v1837_v53 = vmul.f32 %v3851_v51, %v3847_v35 }
 0x589   : > { %v1839_v54 = vpack.c.bf16 %v1837_v53, %v1837_v53 }
 0x58b   : > { %3605 = vmatmul.mubr.msk.bf16.vlgmr.msra.gmra.mrb[16].mxu1 %vm1815_vm5, %v1839_v54 }
 0x58c   : > { %3616 = vmatprep.mubr.msk.bf16.mxu1 %vm3895_vm2, %v3893_v61 }
 0x58d   : > { %3615 = vmatpush3.bf16.xpose.msra.mxu1 %v1995_v55 }
 0x58e   : > { %3626 = vmatprep.subr.bf16.mxu1 %v3893_v61 }
 0x594   : > { %3617 = vmatmul.mubr.msk.bf16.vlgmr.msra.gmra.mrb[20].mxu1 %vm1722_vm3, %v1987_v56 }
 0x595   : > { %3628 = vmatprep.mubr.msk.bf16.mxu1 %vm3895_vm2, %v3893_v61 }
 0x653   : > { %v1979_v59 = vpop.f32.mrb[4].mxu0 }
 0x654   : > { %v3612_v60 = vpop.f32.mrb[5].mxu0  ;;  %v2037_v62 = vsel %vm1815_vm5, %v1979_v59, -inf }
 0x655   : > { %2038 = vmax.xlane.f32.xlu0 %v2037_v62  ;;  %v1982_v63 = vpop.f32.mrb[6].mxu0 }
 0x656   : > { %v4395_v0 = vpop.f32.mrb[12].mxu1  ;;  %v3613_v1 = vpop.f32.mrb[7].mxu0 }
 0x657   : > { %v3600_v2 = vpop.f32.mrb[13].mxu1 }
 0x658   : > { %v1884_v3 = vpop.f32.mrb[14].mxu1 }
 0x659   : > { %v3601_v4 = vpop.f32.mrb[15].mxu1  ;;  %v3336_v3 = vld [vmem:[%s4668_s19] ss:$0 sm:$0xff] }
 0x65e   : > { %v4397_v5 = vpop.f32.mrb[16].mxu1 }
 0x65f   : > { %v3606_v6 = vpop.f32.mrb[17].mxu1 }
 0x660   : > { %v1930_v7 = vpop.f32.mrb[18].mxu1 }
 0x661   : > { %v3607_v8 = vpop.f32.mrb[19].mxu1 }
 0x667   : > { %v2031_v9 = vpop.f32.mrb[20].mxu1 }
 0x668   : > { %v3618_v10 = vpop.f32.mrb[21].mxu1  ;;  %v2040_v11 = vsel %vm1815_vm5, %v2031_v9, -inf }
 0x669   : > { %2041 = vmax.xlane.f32.xlu1 %v2040_v11  ;;  %v2034_v12 = vpop.f32.mrb[22].mxu1  ;;  %v3760_v10 = vld [vmem:[%s4058_s8] ss:$16 sps:$4 sm:$0xff]   ;;  %v3762_v11 = vld [vmem:[%s4058_s8 + $0x4] ss:$16 sps:$4 sm:$0xff]  }
 0x66a   : > { %v3619_v14 = vpop.f32.mrb[23].mxu1  ;;  %v3763_v12 = vld [vmem:[%s4058_s8 + $0x8] ss:$16 sps:$4 sm:$0xff]  }
 0x66b   : > { %v3765_v14 = vld [vmem:[%s4058_s8 + $0xc] ss:$16 sps:$4 sm:$0xff]  }
 0x67a   : > { %2111 = vrot.lane.b32.xlu1 %v1721_v43, %s3896_s27  ;;  %v3758_v43 = vld [vmem:[%s4030_s21 + $0x30] sm:$0xff]   ;;  %s4673_s21 = sld [smem:[#allocation14_spill]] (!%p3412_p5) }
 0x6e2   : > { %v2039_v15 = vpop.xlane.xlu0 %2038 }
 0x6e3   : > { %v2043_v16 = vsub.f32 %v1979_v59, %v2039_v15  ;;  %v3768_v15 = vld [vmem:[%s4058_s8 + $0x24] ss:$16 sps:$4 sm:$0xff]  }
 0x6e5   : > { %v2045_v17 = vmul.f32 1.442695, %v2043_v16  ;;  %v3771_v16 = vld [vmem:[%s4058_s8 + $0x2c] ss:$16 sps:$4 sm:$0xff]  }
 0x6e7   : > { %3852 = vpow2.f32 %v2045_v17 }
 0x6f1   : > { %v3853_v18 = vpop.eup %3852 }
 0x6f2   : > { %v2049_v19 = vsel %vm1815_vm5, %v3853_v18, 0.0 }
 0x6f3   : > { %2050 = vadd.xlane.f32.xlu0 %v2049_v19 }
 0x6f6   : > { %v2042_v20 = vpop.xlane.xlu1 %2041 }
 0x6f7   : > { %v2044_v21 = vsub.f32 %v2031_v9, %v2042_v20 }
 0x6f9   : > { %v2047_v22 = vmul.f32 1.442695, %v2044_v21 }
 0x6fa   : > { %v2112_v24 = vpop.permute.xlu1 %2111 }
 0x6fb   : > { %3854 = vpow2.f32 %v2047_v22  ;;  %v2117_v25 = vsel %vm1843_vm4, %v2112_v24, 0 }
 0x6fc   : > { %3627 = vmatpush3.bf16.msra.mxu1 %v2117_v25 }
 0x6fd   : > { %2539 = vmatprep.subr.bf16.mxu1 %v3762_v11  ;;  %v3810_v11 = vld [vmem:[%s4069_s7] sm:$0xff]  }
 0x705   : > { %v3855_v26 = vpop.eup %3854 }
 0x706   : > { %v2052_v27 = vsel %vm1815_vm5, %v3855_v26, 0.0 }
 0x707   : > { %2053 = vadd.xlane.f32.xlu0 %v2052_v27  ;;  %v3777_v27 = vld [vmem:[%s4058_s8 + $0x4c] ss:$16 sps:$4 sm:$0xff]  }
 0x71d   : > { %2062 = vrot.lane.b32.xlu0 %v4358_v13, %s3896_s27 }
 0x780   : > { %v2051_v28 = vpop.xlane.xlu0 %2050 }
 0x781   : > { %3856 = vrcp.f32 %v2051_v28  ;;  %v3772_v28 = vld [vmem:[%s4058_s8 + $0x40] ss:$16 sps:$4 sm:$0xff]  }
 0x78b   : > { %v3857_v29 = vpop.eup %3856 }
 0x78c   : > { %v2057_v31 = vmul.f32 %v3857_v29, %v3853_v18  ;;  %v3775_v29 = vld [vmem:[%s4058_s8 + $0x48] ss:$16 sps:$4 sm:$0xff]  }
 0x78e   : > { %v2059_v34 = vpack.c.bf16 %v2057_v31, %v2057_v31  ;;  %v3783_v31 = vld [vmem:[%s4058_s8 + $0x6c] ss:$16 sps:$4 sm:$0xff]  }
 0x794   : > { %v2054_v30 = vpop.xlane.xlu0 %2053 }
 0x795   : > { %3858 = vrcp.f32 %v2054_v30  ;;  %v3780_v30 = vld [vmem:[%s4058_s8 + $0x64] ss:$16 sps:$4 sm:$0xff]  }
 0x798   : > { %v2063_v32 = vpop.permute.xlu0 %2062 }
 0x799   : > { %v2068_v33 = vsel %vm1843_vm4, %v2063_v32, 0  ;;  %v3778_v32 = vld [vmem:[%s4058_s8 + $0x60] ss:$16 sps:$4 sm:$0xff]  }
 0x79a   : > { %3621 = vmatpush3.bf16.msra.mxu0 %v2068_v33  ;;  %v3781_v33 = vld [vmem:[%s4058_s8 + $0x68] ss:$16 sps:$4 sm:$0xff]  }
 0x79b   : > { %3632 = vmatprep.subr.bf16.mxu0 %v3893_v61 }
 0x79d   : > { %3623 = vmatmul.mubr.msk.bf16.vlgmr.msra.gmra.mrb[8].mxu0 %vm1815_vm5, %v2059_v34  ;;  %v3786_v34 = vld [vmem:[%s4058_s8 + $0x84] ss:$16 sps:$4 sm:$0xff]  }
 0x79e   : > { %3648 = vmatprep.mubr.msk.bf16.mxu0 %vm3895_vm2, %v3893_v61  ;;  %3633 = vmatpush3.bf16.msra.mxu0 %v3752_v37  ;;  %v3792_v37 = vld [vmem:[%s4058_s8 + $0xa4] ss:$16 sps:$4 sm:$0xff]  }
 0x79f   : > { %v3859_v13 = vpop.eup %3858  ;;  %3634 = vmatprep.subr.bf16.mxu0 %v3893_v61 }
 0x7a0   : > { %v2058_v35 = vmul.f32 %v3859_v13, %v3855_v26  ;;  %v3774_v26 = vld [vmem:[%s4058_s8 + $0x44] ss:$16 sps:$4 sm:$0xff]   ;;  %v3789_v13 = vld [vmem:[%s4058_s8 + $0x8c] ss:$16 sps:$4 sm:$0xff]  }
 0x7a2   : > { %v2060_v36 = vpack.c.bf16 %v2058_v35, %v2058_v35  ;;  %3635 = vmatpush3.bf16.msra.mxu0 %v3753_v38  ;;  %v3784_v35 = vld [vmem:[%s4058_s8 + $0x80] ss:$16 sps:$4 sm:$0xff]   ;;  %v3795_v38 = vld [vmem:[%s4058_s8 + $0xac] ss:$16 sps:$4 sm:$0xff]  }
 0x7a3   : > { %3636 = vmatprep.subr.bf16.mxu0 %v3893_v61 }
 0x7a4   : > { %3629 = vmatmul.mubr.msk.bf16.vlgmr.msra.gmra.mrb[24].mxu1 %vm1815_vm5, %v2060_v36  ;;  %v3787_v36 = vld [vmem:[%s4058_s8 + $0x88] ss:$16 sps:$4 sm:$0xff]  }
 0x7a5   : > { %2571 = vmatprep.mubr.bf16.mxu1 %v3894_v23  ;;  %2540 = vmatpush1.bf16.msra.mxu1 %v3760_v10  ;;  %v3809_v10 = vld [vmem:[%s4069_s7 + $0xc0] sm:$0xff]  }
 0x7a6   : > { %3637 = vmatpush3.bf16.msra.mxu0 %v3754_v39  ;;  %2541 = vmatprep.subr.bf16.mxu1 %v3768_v15  ;;  %v3790_v39 = vld [vmem:[%s4058_s8 + $0xa0] ss:$16 sps:$4 sm:$0xff]   ;;  %v3813_v15 = vld [vmem:[%s4069_s7 + $0xc8] sm:$0xff]  }
 0x7a7   : > { %3638 = vmatprep.subr.bf16.mxu0 %v3893_v61 }
 0x7aa   : > { %3639 = vmatpush3.bf16.msra.mxu0 %v3755_v40  ;;  %v3793_v40 = vld [vmem:[%s4058_s8 + $0xa8] ss:$16 sps:$4 sm:$0xff]  }
 0x7ab   : > { %3640 = vmatprep.subr.bf16.mxu0 %v3893_v61 }
 0x7ae   : > { %3641 = vmatpush3.bf16.msra.mxu0 %v3756_v41  ;;  %v3798_v41 = vld [vmem:[%s4058_s8 + $0xc4] ss:$16 sps:$4 sm:$0xff]  }
 0x7af   : > { %3642 = vmatprep.subr.bf16.mxu0 %v3893_v61 }
 0x7b2   : > { %3643 = vmatpush3.bf16.msra.mxu0 %v3757_v42  ;;  %v3801_v42 = vld [vmem:[%s4058_s8 + $0xcc] ss:$16 sps:$4 sm:$0xff]  }
 0x7b3   : > { %3644 = vmatprep.subr.bf16.mxu0 %v3893_v61 }
 0x7b6   : > { %3645 = vmatpush3.bf16.msra.mxu0 %v3758_v43  ;;  %v3796_v43 = vld [vmem:[%s4058_s8 + $0xc0] ss:$16 sps:$4 sm:$0xff]  }
 0x7b7   : > { %3646 = vmatprep.subr.bf16.mxu0 %v3893_v61 }
 0x7ba   : > { %3647 = vmatpush3.bf16.msra.mxu0 %v3759_v44  ;;  %v3799_v44 = vld [vmem:[%s4058_s8 + $0xc8] ss:$16 sps:$4 sm:$0xff]  }
 0x7bb   : > { %2582 = vmatprep.subr.bf16.mxu0 %v3765_v14  ;;  %v3812_v14 = vld [vmem:[%s4069_s7 + $0x48] sm:$0xff]  }
 0x870   : > { %v2104_v45 = vpop.f32.mrb[8].mxu0 }
 0x871   : > { %v3624_v46 = vpop.f32.mrb[9].mxu0 }
 0x872   : > { %v2107_v49 = vpop.f32.mrb[10].mxu0  ;;  %v3802_v46 = vld [vmem:[%s4058_s8 + $0xe0] ss:$16 sps:$4 sm:$0xff]  }
 0x873   : > { %v3625_v51 = vpop.f32.mrb[11].mxu0  ;;  %v3805_v49 = vld [vmem:[%s4058_s8 + $0xe8] ss:$16 sps:$4 sm:$0xff]  }
 0x874   : > { %v3807_v51 = vld [vmem:[%s4058_s8 + $0xec] ss:$16 sps:$4 sm:$0xff]  }
 0x877   : > { %v2153_v53 = vpop.f32.mrb[24].mxu1 }
 0x878   : > { %v3715_v54 = vpack.i.bf16 %v2153_v53, %v2104_v45  ;;  %v3630_v55 = vpop.f32.mrb[25].mxu1  ;;  %v3804_v45 = vld [vmem:[%s4058_s8 + $0xe4] ss:$16 sps:$4 sm:$0xff]  }
 0x879   : > { %v2156_v56 = vpop.f32.mrb[26].mxu1 }
 0x87a   : > { %3716 = vrot.lane.b32.xlu1 %v3715_v54, %s3896_s27  ;;  %v3631_v59 = vpop.f32.mrb[27].mxu1 }
 0x8ec   : > { %v3717_v60 = vpop.permute.xlu1 %3716 }
 0x8ed   : > { %v3719_v62 = vunpack.i.h.bf16 %v3717_v60  ;;  %v3718_v63 = vunpack.i.l.bf16 %v3717_v60 }
 0x8ef   : > { %v2168_v61 = vsel %vm1722_vm3, %v4397_v5, %v3719_v62  ;;  %v2167_v1 = vsel %vm1722_vm3, %v4395_v0, %v3718_v63 }
 0x8f0   : > { %v2169_v2 = vpack.c.bf16 %v2168_v61, %v2167_v1  ;;  %v3345_v61 = vld [vmem:[%s4669_s25] ss:$0 sm:$0xff] }
 0x8f2   : > { %3649 = vmatmul.mubr.bf16.vlgmr.msra.gmra.mrb[12].mxu0 %v2169_v2 }
 0x8f3   : > { %2614 = vmatprep.mubr.bf16.mxu0 %v3894_v23  ;;  %2583 = vmatpush1.bf16.msra.mxu0 %v3763_v12  ;;  %v3811_v12 = vld [vmem:[%s4069_s7 + $0x80] sm:$0xff]  }
 0x8f4   : > { %2584 = vmatprep.subr.bf16.mxu0 %v3771_v16  ;;  %v3814_v16 = vld [vmem:[%s4069_s7 + $0x8] sm:$0xff]  }
 0x9c5   : > { %v2275_v4 = vpop.f32.mrb[12].mxu0 }
 0x9c6   : > { %v2276_v5 = vadd.f32 %v3336_v3, %v2275_v4  ;;  %v3650_v6 = vpop.f32.mrb[13].mxu0  ;;  %v3346_v4 = vld [vmem:[%s4670_s3] ss:$0 sm:$0xff] }
 0x9c7   : > { %v2278_v7 = vpop.f32.mrb[14].mxu0 }
 0x9c8   : > { %v4440_v0 = vadd.f32 %v2276_v5, %v4268_v57  ;;  %v2279_v8 = vadd.f32 %v3336_v3, %v2278_v7  ;;  %v3651_v9 = vpop.f32.mrb[15].mxu0  ;;  %v3766_v57 = vld [vmem:[%s4058_s8 + $0x20] ss:$16 sps:$4 sm:$0xff]  }
 0x9c9   : > { %2542 = vmatpush1.bf16.msra.mxu1 %v3766_v57  ;;  %v3808_v9 = vld [vmem:[%s4069_s7 + $0x40] sm:$0xff]   ;;  %v3815_v57 = vld [vmem:[%s4069_s7 + $0x88] sm:$0xff]  }
 0x9ca   : > { %v4443_v23 = vadd.f32 %v2279_v8, %v4270_v58  ;;  %2286 = vadd.xlane.f32.xlu1 %v4440_v0  ;;  %v3769_v58 = vld [vmem:[%s4058_s8 + $0x28] ss:$16 sps:$4 sm:$0xff]   ;;  %2543 = vmatprep.subr.bf16.mxu1 %v3774_v26  ;;  %v3825_v26 = vld [vmem:[%s4069_s7 + $0xe0] sm:$0xff]  }
 0x9cb   : > { %2585 = vmatpush1.bf16.msra.mxu0 %v3769_v58  ;;  %v3816_v58 = vld [vmem:[%s4069_s7 + $0x50] sm:$0xff]  }
 0x9cc   : > { %2288 = vadd.xlane.f32.xlu0 %v4443_v23  ;;  %2586 = vmatprep.subr.bf16.mxu0 %v3777_v27  ;;  %v3826_v27 = vld [vmem:[%s4069_s7 + $0x20] sm:$0xff]  }
 0x9cd   : > { %2544 = vmatpush1.bf16.msra.mxu1 %v3772_v28  ;;  %v3827_v28 = vld [vmem:[%s4069_s7 + $0xa0] sm:$0xff]  }
 0x9ce   : > { %2545 = vmatprep.subr.bf16.mxu1 %v3780_v30  ;;  %v3829_v30 = vld [vmem:[%s4069_s7 + $0xe8] sm:$0xff]  }
 0x9cf   : > { %2587 = vmatpush1.bf16.msra.mxu0 %v3775_v29  ;;  %v3828_v29 = vld [vmem:[%s4069_s7 + $0x68] sm:$0xff]  }
 0x9d0   : > { %2588 = vmatprep.subr.bf16.mxu0 %v3783_v31  ;;  %v3830_v31 = vld [vmem:[%s4069_s7 + $0x28] sm:$0xff]  }
 0x9d1   : > { %2546 = vmatpush1.bf16.msra.mxu1 %v3778_v32  ;;  %v3831_v32 = vld [vmem:[%s4069_s7 + $0xa8] sm:$0xff]  }
 0x9d2   : > { %2547 = vmatprep.subr.bf16.mxu1 %v3786_v34  ;;  %v3833_v34 = vld [vmem:[%s4069_s7 + $0xf0] sm:$0xff]  }
 0x9d3   : > { %2589 = vmatpush1.bf16.msra.mxu0 %v3781_v33  ;;  %v3832_v33 = vld [vmem:[%s4069_s7 + $0x70] sm:$0xff]  }
 0x9d4   : > { %2590 = vmatprep.subr.bf16.mxu0 %v3789_v13  ;;  %v3834_v13 = vld [vmem:[%s4069_s7 + $0x30] sm:$0xff]  }
 0x9d5   : > { %2548 = vmatpush1.bf16.msra.mxu1 %v3784_v35  ;;  %v3835_v35 = vld [vmem:[%s4069_s7 + $0xb0] sm:$0xff]  }
 0x9d6   : > { %2549 = vmatprep.subr.bf16.mxu1 %v3792_v37  ;;  %v3837_v37 = vld [vmem:[%s4069_s7 + $0xf8] sm:$0xff]  }
 0x9d7   : > { %2591 = vmatpush1.bf16.msra.mxu0 %v3787_v36  ;;  %v3836_v36 = vld [vmem:[%s4069_s7 + $0x78] sm:$0xff]  }
 0x9d8   : > { %2592 = vmatprep.subr.bf16.mxu0 %v3795_v38  ;;  %v3838_v38 = vld [vmem:[%s4069_s7 + $0x38] sm:$0xff]  }
 0x9d9   : > { %2550 = vmatpush1.bf16.msra.mxu1 %v3790_v39  ;;  %v3839_v39 = vld [vmem:[%s4069_s7 + $0xb8] sm:$0xff]  }
 0x9da   : > { %2551 = vmatprep.subr.bf16.mxu1 %v3798_v41  ;;  %v2373_v41 = vsub.s32 3, %v4337_v47 }
 0x9db   : > { %2593 = vmatpush1.bf16.msra.mxu0 %v3793_v40  ;;  %v2357_v40 = vld [vmem:[%s4064_s29] sm:$0xf] }
 0x9dc   : > { %2594 = vmatprep.subr.bf16.mxu0 %v3801_v42  ;;  %v2362_v42 = vrot.slane %v2357_v40, %v1491_v52 }
 0x9dd   : > { %2552 = vmatpush1.bf16.msra.mxu1 %v3796_v43  ;;  %v2370_v43 = vrot.slane %v2357_v40, %v1499_v50 }
 0x9de   : > { %2553 = vmatprep.subr.bf16.mxu1 %v3804_v45  ;;  %v2374_v45 = vrot.slane %v2357_v40, %v2373_v41 }
 0x9df   : > { %2595 = vmatpush1.bf16.msra.mxu0 %v3799_v44  ;;  %v2366_v44 = vrot.slane %v2357_v40, %v1495_v48 }
 0x9e0   : > { %2596 = vmatprep.subr.bf16.mxu0 %v3807_v51 }
 0x9e1   : > { %2554 = vmatpush1.bf16.msra.mxu1 %v3802_v46 }
 0x9e2   : > { %3520 = vmatprep.subr.bf16.mxu1 %v3808_v9 }
 0x9e3   : > { %2597 = vmatpush1.bf16.msra.mxu0 %v3805_v49 }
 0x9e4   : > { %3542 = vmatprep.subr.bf16.mxu0 %v3809_v10 }
 0xa57   : > { %v2287_v17 = vpop.xlane.xlu1 %2286 }
 0xa58   : > { %v2290_v18 = vmul.f32 0.0078125, %v2287_v17  ;;  %v3817_v17 = vld [vmem:[%s4069_s7 + $0xd0] sm:$0xff]  }
 0xa59   : > { %v2289_v19 = vpop.xlane.xlu0 %2288 }
 0xa5a   : > { %v4456_v20 = vsub.f32 %v4440_v0, %v2290_v18  ;;  %v2291_v21 = vmul.f32 0.0078125, %v2289_v19  ;;  %v3818_v18 = vld [vmem:[%s4069_s7 + $0x10] sm:$0xff]  }
 0xa5b   : > { %v3819_v19 = vld [vmem:[%s4069_s7 + $0x90] sm:$0xff]  }
 0xa5c   : > { %v4459_v22 = vsub.f32 %v4443_v23, %v2291_v21  ;;  %v2294_v24 = vmul.f32 %v4456_v20, %v4456_v20  ;;  %v3821_v21 = vld [vmem:[%s4069_s7 + $0xd8] sm:$0xff]  }
 0xa5e   : > { %2296 = vadd.xlane.f32.xlu0 %v2294_v24  ;;  %v2295_v25 = vmul.f32 %v4459_v22, %v4459_v22  ;;  %v3823_v24 = vld [vmem:[%s4069_s7 + $0x98] sm:$0xff]  }
 0xa62   : > { %2298 = vadd.xlane.f32.xlu0 %v2295_v25  ;;  %v3824_v25 = vld [vmem:[%s4069_s7 + $0x60] sm:$0xff]  }
 0xaeb   : > { %v2297_v53 = vpop.xlane.xlu0 %2296 }
 0xaec   : > { %v2300_v54 = vmul.f32 0.0078125, %v2297_v53 }
 0xaee   : > { %v2302_v55 = vadd.f32 1e-06, %v2300_v54 }
 0xaef   : > { %v2299_v56 = vpop.xlane.xlu0 %2298 }
 0xaf0   : > { %3860 = vrsqrt.f32 %v2302_v55  ;;  %v2301_v59 = vmul.f32 0.0078125, %v2299_v56 }
 0xaf2   : > { %v2303_v60 = vadd.f32 1e-06, %v2301_v59 }
 0xaf4   : > { %3862 = vrsqrt.f32 %v2303_v60 }
 0xafa   : > { %v3861_v62 = vpop.eup %3860 }
 0xafb   : > { %v2306_v63 = vmul.f32 %v3861_v62, %v4456_v20  ;;  %v3820_v20 = vld [vmem:[%s4069_s7 + $0x58] sm:$0xff]  }
 0xafd   : > { %v2314_v3 = vmul.f32 %v3345_v61, %v2306_v63 }
 0xafe   : > { %v3863_v1 = vpop.eup %3862 }
 0xaff   : > { %v2307_v2 = vmul.f32 %v3863_v1, %v4459_v22  ;;  %v2322_v6 = vadd.f32 %v3346_v4, %v2314_v3  ;;  %v3822_v22 = vld [vmem:[%s4069_s7 + $0x18] sm:$0xff]  }
 0xb01   : > { %v2315_v5 = vmul.f32 %v3345_v61, %v2307_v2 }
 0xb03   : > { %v2323_v7 = vadd.f32 %v3346_v4, %v2315_v5 }
 0xb05   : > { %v2324_v8 = vpack.c.bf16 %v2323_v7, %v2322_v6 }
 0xb07   : > { %2572 = vmatmul.mubr.bf16.vlgmr.msra.gmra.mrb[28].mxu1 %v2324_v8  ;;  %2615 = vmatmul.mubr.bf16.vlgmr.msra.gmra.mrb[16].mxu0 %v2324_v8 }
 0xb08   : > { %3521 = vmatpush3.bf16.msra.mxu1 %v3810_v11  ;;  %3543 = vmatpush3.bf16.msra.mxu0 %v3811_v12 }
 0xb09   : > { %3522 = vmatprep.subr.bf16.mxu1 %v3812_v14  ;;  %3544 = vmatprep.subr.bf16.mxu0 %v3813_v15 }
 0xb0c   : > { %3523 = vmatpush3.bf16.msra.mxu1 %v3814_v16  ;;  %3545 = vmatpush3.bf16.msra.mxu0 %v3815_v57 }
 0xb0d   : > { %3524 = vmatprep.subr.bf16.mxu1 %v3816_v58  ;;  %3546 = vmatprep.subr.bf16.mxu0 %v3817_v17 }
 0xb10   : > { %3525 = vmatpush3.bf16.msra.mxu1 %v3818_v18  ;;  %3547 = vmatpush3.bf16.msra.mxu0 %v3819_v19 }
 0xb11   : > { %3526 = vmatprep.subr.bf16.mxu1 %v3820_v20  ;;  %3548 = vmatprep.subr.bf16.mxu0 %v3821_v21 }
 0xb14   : > { %3527 = vmatpush3.bf16.msra.mxu1 %v3822_v22  ;;  %3549 = vmatpush3.bf16.msra.mxu0 %v3823_v24 }
 0xb15   : > { %3528 = vmatprep.subr.bf16.mxu1 %v3824_v25  ;;  %3550 = vmatprep.subr.bf16.mxu0 %v3825_v26 }
 0xb18   : > { %3529 = vmatpush3.bf16.msra.mxu1 %v3826_v27  ;;  %3551 = vmatpush3.bf16.msra.mxu0 %v3827_v28 }
 0xb19   : > { %3530 = vmatprep.subr.bf16.mxu1 %v3828_v29  ;;  %3552 = vmatprep.subr.bf16.mxu0 %v3829_v30 }
 0xb1c   : > { %3531 = vmatpush3.bf16.msra.mxu1 %v3830_v31  ;;  %3553 = vmatpush3.bf16.msra.mxu0 %v3831_v32 }
 0xb1d   : > { %3532 = vmatprep.subr.bf16.mxu1 %v3832_v33  ;;  %3554 = vmatprep.subr.bf16.mxu0 %v3833_v34 }
 0xb20   : > { %3533 = vmatpush3.bf16.msra.mxu1 %v3834_v13  ;;  %3555 = vmatpush3.bf16.msra.mxu0 %v3835_v35 }
 0xb21   : > { %3534 = vmatprep.subr.bf16.mxu1 %v3836_v36  ;;  %3556 = vmatprep.subr.bf16.mxu0 %v3837_v37 }
 0xb24   : > { %3535 = vmatpush3.bf16.msra.mxu1 %v3838_v38  ;;  %3557 = vmatpush3.bf16.msra.mxu0 %v3839_v39 }
 0xbda   : > { %v2573_v46 = vpop.f32.mrb[28].mxu1  ;;  %v2616_v49 = vpop.f32.mrb[16].mxu0 }
 0xbdb   : > { %v4541_v51 = vadd.f32 %v2573_v46, %v2362_v42  ;;  %v4543_v53 = vadd.f32 %v2616_v49, %v2370_v43  ;;  %v2575_v54 = vpop.f32.mrb[29].mxu1  ;;  %v2618_v55 = vpop.f32.mrb[17].mxu0 }
 0xbdc   : > { %v4545_v56 = vadd.f32 %v2575_v54, %v2366_v44  ;;  %v4547_v59 = vadd.f32 %v2618_v55, %v2374_v45  ;;  %v2577_v52 = vpop.f32.mrb[30].mxu1  ;;  %v2620_v60 = vpop.f32.mrb[18].mxu0 }
 0xbdd   : > { %v2625_v50 = vmul.f32 %v4541_v51, %v4541_v51  ;;  %v2627_v47 = vmul.f32 %v4543_v53, %v4543_v53  ;;  %v4553_v48 = vadd.f32 %v2577_v52, %v2362_v42  ;;  %v4555_v62 = vadd.f32 %v2620_v60, %v2370_v43  ;;  %v2579_v63 = vpop.f32.mrb[31].mxu1  ;;  %v2622_v61 = vpop.f32.mrb[19].mxu0 }
 0xbde   : > { %v2626_v1 = vmul.f32 %v4545_v56, %v4545_v56  ;;  %v2628_v2 = vmul.f32 %v4547_v59, %v4547_v59  ;;  %v4561_v3 = vadd.f32 %v2579_v63, %v2366_v44  ;;  %v4563_v4 = vadd.f32 %v2622_v61, %v2374_v45 }
 0xbdf   : > { %v2633_v5 = vmul.f32 %v2625_v50, %v4541_v51  ;;  %v2635_v6 = vmul.f32 %v2627_v47, %v4543_v53  ;;  %v2629_v7 = vmul.f32 %v4553_v48, %v4553_v48  ;;  %v2631_v8 = vmul.f32 %v4555_v62, %v4555_v62 }
 0xbe0   : > { %v2634_v9 = vmul.f32 %v2626_v1, %v4545_v56  ;;  %v2636_v10 = vmul.f32 %v2628_v2, %v4547_v59  ;;  %v2630_v11 = vmul.f32 %v4561_v3, %v4561_v3  ;;  %v2632_v12 = vmul.f32 %v4563_v4, %v4563_v4 }
 0xbe1   : > { %v2641_v14 = vmul.f32 0.044715, %v2633_v5  ;;  %v2643_v15 = vmul.f32 0.044715, %v2635_v6  ;;  %v2637_v16 = vmul.f32 %v2629_v7, %v4553_v48  ;;  %v2639_v57 = vmul.f32 %v2631_v8, %v4555_v62 }
 0xbe2   : > { %v2642_v58 = vmul.f32 0.044715, %v2634_v9  ;;  %v2644_v17 = vmul.f32 0.044715, %v2636_v10  ;;  %v2638_v18 = vmul.f32 %v2630_v11, %v4561_v3  ;;  %v2640_v19 = vmul.f32 %v2632_v12, %v4563_v4 }
 0xbe3   : > { %v2649_v20 = vadd.f32 %v2641_v14, %v4541_v51  ;;  %v2651_v21 = vadd.f32 %v2643_v15, %v4543_v53  ;;  %v2645_v22 = vmul.f32 0.044715, %v2637_v16  ;;  %v2647_v24 = vmul.f32 0.044715, %v2639_v57 }
 0xbe4   : > { %v2650_v25 = vadd.f32 %v2642_v58, %v4545_v56  ;;  %v2652_v26 = vadd.f32 %v2644_v17, %v4547_v59  ;;  %v2646_v27 = vmul.f32 0.044715, %v2638_v18  ;;  %v2648_v28 = vmul.f32 0.044715, %v2640_v19 }
 0xbe5   : > { %v2657_v29 = vmul.f32 0.7978846, %v2649_v20  ;;  %v2659_v30 = vmul.f32 0.7978846, %v2651_v21  ;;  %v2653_v31 = vadd.f32 %v2645_v22, %v4553_v48  ;;  %v2655_v32 = vadd.f32 %v2647_v24, %v4555_v62 }
 0xbe6   : > { %v2658_v33 = vmul.f32 0.7978846, %v2650_v25  ;;  %v2660_v34 = vmul.f32 0.7978846, %v2652_v26  ;;  %v2654_v13 = vadd.f32 %v2646_v27, %v4561_v3  ;;  %v2656_v35 = vadd.f32 %v2648_v28, %v4563_v4 }
 0xbe7   : > { %3864 = vtanh.f32 %v2657_v29  ;;  %v2661_v36 = vmul.f32 0.7978846, %v2653_v31  ;;  %v2663_v37 = vmul.f32 0.7978846, %v2655_v32 }
 0xbe8   : > { %3866 = vtanh.f32 %v2659_v30  ;;  %v2662_v38 = vmul.f32 0.7978846, %v2654_v13  ;;  %v2664_v39 = vmul.f32 0.7978846, %v2656_v35 }
 0xbe9   : > { %3868 = vtanh.f32 %v2658_v33 }
 0xbea   : > { %3870 = vtanh.f32 %v2660_v34 }
 0xbeb   : > { %3872 = vtanh.f32 %v2661_v36 }
 0xbec   : > { %3874 = vtanh.f32 %v2663_v37 }
 0xbed   : > { %3876 = vtanh.f32 %v2662_v38 }
 0xbee   : > { %3878 = vtanh.f32 %v2664_v39 }
 0xbf1   : > { %v3865_v40 = vpop.eup %3864 }
 0xbf2   : > { %v3867_v41 = vpop.eup %3866  ;;  %v2673_v42 = vadd.f32 1.0, %v3865_v40 }
 0xbf3   : > { %v3869_v43 = vpop.eup %3868  ;;  %v2675_v44 = vadd.f32 1.0, %v3867_v41 }
 0xbf4   : > { %v3871_v45 = vpop.eup %3870  ;;  %v2674_v46 = vadd.f32 1.0, %v3869_v43  ;;  %v2681_v52 = vmul.f32 0.5, %v2673_v42 }
 0xbf5   : > { %v3873_v49 = vpop.eup %3872  ;;  %v2676_v54 = vadd.f32 1.0, %v3871_v45  ;;  %v2683_v47 = vmul.f32 0.5, %v2675_v44 }
 0xbf6   : > { %v3875_v55 = vpop.eup %3874  ;;  %v2677_v60 = vadd.f32 1.0, %v3873_v49  ;;  %v2682_v5 = vmul.f32 0.5, %v2674_v46  ;;  %v2689_v9 = vmul.f32 %v2681_v52, %v4541_v51 }
 0xbf7   : > { %v3877_v50 = vpop.eup %3876  ;;  %v2679_v63 = vadd.f32 1.0, %v3875_v55  ;;  %v2684_v8 = vmul.f32 0.5, %v2676_v54  ;;  %v2691_v12 = vmul.f32 %v2683_v47, %v4543_v53  ;;  %v3414_v54 = vld [vmem:[%s4672_s28] ss:$0 sm:$0xff] (!%p3412_p5) }
 0xbf8   : > { %v3879_v61 = vpop.eup %3878  ;;  %v2685_v1 = vmul.f32 0.5, %v2677_v60  ;;  %v2678_v2 = vadd.f32 1.0, %v3877_v50  ;;  %v2690_v16 = vmul.f32 %v2682_v5, %v4545_v56  ;;  %v3379_v56 = vld [vmem:[%s792_s0] ss:$0 sm:$0xff]  ;;  %s4671_s0 = sld [smem:[#allocation12_spill]] (!%p3412_p5) }
 0xbf9   : > { %v2687_v6 = vmul.f32 0.5, %v2679_v63  ;;  %v2680_v7 = vadd.f32 1.0, %v3879_v61  ;;  %v2692_v17 = vmul.f32 %v2684_v8, %v4547_v59 }
 0xbfa   : > { %v2693_v10 = vmul.f32 %v2685_v1, %v4553_v48  ;;  %v2686_v11 = vmul.f32 0.5, %v2678_v2 }
 0xbfb   : > { %v2695_v14 = vmul.f32 %v2687_v6, %v4555_v62  ;;  %v2688_v15 = vmul.f32 0.5, %v2680_v7 }
 0xbfc   : > { %v2694_v57 = vmul.f32 %v2686_v11, %v4561_v3  ;;  %v2697_v58 = vpack.c.bf16 %v2693_v10, %v2689_v9 }
 0xbfd   : > { %v2696_v18 = vmul.f32 %v2688_v15, %v4563_v4  ;;  %v2699_v19 = vpack.c.bf16 %v2695_v14, %v2691_v12 }
 0xbfe   : > { %v2698_v51 = vpack.c.bf16 %v2694_v57, %v2690_v16  ;;  %v3413_v46 = vld [vmem:[%s4671_s0] ss:$0 sm:$0xff] (!%p3412_p5) }
 0xbff   : > { %v2700_v20 = vpack.c.bf16 %v2696_v18, %v2692_v17 }
 0xc00   : > { %2996 = vmatprep.mubr.bf16.mxu1 %v2698_v51 }
 0xc01   : > { %3037 = vmatprep.mubr.bf16.mxu0 %v2700_v20  ;;  %2997 = vmatmul.mubr.bf16.vlgmr.msra.gmra.mrb[32].mxu1 %v2697_v58 }
 0xc02   : > { %3038 = vmatmul.mubr.bf16.vlgmr.msra.gmra.mrb[20].mxu0 %v2699_v19 }
 0xcd4   : > { %v3536_v53 = vpop.f32.mrb[32].mxu1 }
 0xcd5   : > { %v3558_v48 = vpop.f32.mrb[20].mxu0  ;;  %v3537_v62 = vpop.f32.mrb[33].mxu1 }
 0xcd6   : > { %v3538_v3 = vadd.f32 %v3537_v62, %v3536_v53  ;;  %v3559_v21 = vpop.f32.mrb[21].mxu0  ;;  %v3539_v59 = vpop.f32.mrb[34].mxu1 }
 0xcd7   : > { %v3560_v22 = vadd.f32 %v3559_v21, %v3558_v48  ;;  %v3561_v4 = vpop.f32.mrb[22].mxu0  ;;  %v3540_v24 = vpop.f32.mrb[35].mxu1 }
 0xcd8   : > { %v2999_v25 = vadd.f32 %v3538_v3, %v3379_v56  ;;  %v3541_v26 = vadd.f32 %v3540_v24, %v3539_v59  ;;  %v3562_v27 = vpop.f32.mrb[23].mxu0 }
 0xcd9   : > { %v3563_v28 = vadd.f32 %v3562_v27, %v3561_v4 }
 0xcda   : > { %v3040_v29 = vadd.f32 %v3560_v22, %v2999_v25  ;;  %v3002_v30 = vadd.f32 %v3541_v26, %v3379_v56  ;;  %3053 = sbr.rel (%p3412_p5) target bundleno = 3610 (0xe1a), region = 108 }
 0xcdc   : > { %v3046_v31 = vadd.f32 %v3040_v29, %v4440_v0  ;;  %v3043_v32 = vadd.f32 %v3563_v28, %v3002_v30 }
 0xcde   : > { %3048 = vst [vmem:[#allocation2] sm:$0xff] %v3046_v31  ;;  %v3047_v33 = vadd.f32 %v3043_v32, %v4443_v23  ;;  %3056 = vadd.xlane.f32.xlu0 (!%p3412_p5), %v3046_v31 }
 0xce0   : > { %3049 = vst [vmem:[#allocation2 + $0x8] sm:$0xff] %v3047_v33 }
 0xce2   : > { %3058 = vadd.xlane.f32.xlu0 %v3047_v33 }
 0xd6b   : > { %v3057_v34 = vpop.xlane.xlu0 %3056 }
 0xd6c   : > { %v3060_v13 = vmul.f32 0.0078125, %v3057_v34 }
 0xd6e   : > { %v3062_v35 = vsub.f32 %v3046_v31, %v3060_v13 }
 0xd6f   : > { %v3059_v36 = vpop.xlane.xlu0 %3058 }
 0xd70   : > { %v3061_v37 = vmul.f32 0.0078125, %v3059_v36  ;;  %v3064_v38 = vmul.f32 %v3062_v35, %v3062_v35 }
 0xd72   : > { %v3063_v39 = vsub.f32 %v3047_v33, %v3061_v37  ;;  %3066 = vadd.xlane.f32.xlu1 %v3064_v38 }
 0xd74   : > { %v3065_v40 = vmul.f32 %v3063_v39, %v3063_v39 }
 0xd76   : > { %3068 = vadd.xlane.f32.xlu1 %v3065_v40 }
 0xdff   : > { %v3067_v0 = vpop.xlane.xlu1 %3066 }
 0xe00   : > { %v3070_v41 = vmul.f32 0.0078125, %v3067_v0 }
 0xe02   : > { %v3072_v42 = vadd.f32 1e-06, %v3070_v41 }
 0xe03   : > { %v3069_v23 = vpop.xlane.xlu1 %3068 }
 0xe04   : > { %3880 = vrsqrt.f32 %v3072_v42  ;;  %v3071_v43 = vmul.f32 0.0078125, %v3069_v23 }
 0xe06   : > { %v3073_v44 = vadd.f32 1e-06, %v3071_v43 }
 0xe08   : > { %3882 = vrsqrt.f32 %v3073_v44 }
 0xe0e   : > { %v3881_v45 = vpop.eup %3880 }
 0xe0f   : > { %v3076_v49 = vmul.f32 %v3881_v45, %v3062_v35 }
 0xe11   : > { %v3084_v55 = vmul.f32 %v3413_v46, %v3076_v49 }
 0xe12   : > { %v3883_v52 = vpop.eup %3882 }
 0xe13   : > { %v3092_v60 = vadd.f32 %v3414_v54, %v3084_v55  ;;  %v3077_v50 = vmul.f32 %v3883_v52, %v3063_v39 }
 0xe15   : > { %3094 = vst [vmem:[%s4673_s21] sm:$0xff] %v3092_v60  ;;  %v3085_v47 = vmul.f32 %v3413_v46, %v3077_v50 }
 0xe17   : > { %v3093_v63 = vadd.f32 %v3414_v54, %v3085_v47 }
 0xe19   : > { %3095 = vst [vmem:[%s4673_s21 + $0x8] sm:$0xff] %v3093_v63 }
 0xe1a PF: > { %s4674_s8 = sld [smem:[#allocation3_spill]] }
 0xe20   : > { %s30_s1 = sadd.s32 1, %s4674_s8  }
 0xe21   : > { %p27_p6 = scmp.ge.s32.totalorder %s30_s1, 4  }
 0xe23   :  { %29 = sbr.rel (!%p27_p6) target bundleno = 12 (0xc), region = 167 }

</bundles_post_ra>
